<compile_context>
chip_gen: v5e
topology: v5e:2x2
jax: 0.10.0
libtpu: 0.0.40
codegen_flags: <defaults>
</compile_context>

<pallas_src>
import math
import functools

import jax
import jax.numpy as jnp
from jax import lax
from jax.experimental import pallas as pl
from jax.experimental.pallas import tpu as pltpu


def _logsumexp(a, axis):
    m = jnp.max(a, axis=axis, keepdims=True)
    return m + jnp.log(jnp.sum(jnp.exp(a - m), axis=axis, keepdims=True))


def _image_agg_kernel(x_ref, w1_ref, b1_ref, w2f_ref, b2f_ref,
                      w2s_ref, b2s_ref, invt_ref, o_ref, *, num_iters):
    bb, c, n_pix = x_ref.shape
    hd, d = w2f_ref.shape
    k = w2s_ref.shape[1]

    # ---- channels-first (Bb, C, N) block -> channels-last rows (Bb*N, C).
    # Transpose done in f32 (well-supported XLU path); MXU operand back in bf16.
    xt = jnp.transpose(x_ref[...].astype(jnp.float32), (0, 2, 1))            # (Bb, N, C)
    x2d = xt.reshape(bb * n_pix, c).astype(jnp.bfloat16)                     # (rows, C)

    # ---- fused first layer of both heads: (rows, C) @ (C, 2*Hd), bf16 MXU, f32 acc
    h = jnp.dot(x2d, w1_ref[...], preferred_element_type=jnp.float32) + b1_ref[...]
    h = jnp.maximum(h, 0.0)                                                  # f32 elementwise (v5e-safe)
    # TODO(synk): nn.Dropout is stochastic in train mode; implemented as identity (inference).
    h_bf = h.astype(jnp.bfloat16)

    # ---- second layers; Hd split lands on a 128-lane boundary (no relayout)
    f2d = jnp.dot(h_bf[:, :hd], w2f_ref[...],
                  preferred_element_type=jnp.float32) + b2f_ref[...]         # (rows, D) f32
    s2d = jnp.dot(h_bf[:, hd:], w2s_ref[...],
                  preferred_element_type=jnp.float32) + b2s_ref[...]         # (rows, K) f32, already /reg

    f = f2d.astype(jnp.bfloat16).reshape(bb, n_pix, d)                       # (Bb, N, D) bf16 agg operand
    m_kn = jnp.transpose(s2d.reshape(bb, n_pix, k), (0, 2, 1))               # (Bb, K, N) f32, pixels on lanes

    # ---- log-domain optimal transport (statically unrolled), all f32 VPU/EUP math
    log_norm = -math.log(n_pix)                                              # log_a == log_b == -log(n)
    if num_iters > 0:
        u = log_norm - _logsumexp(m_kn, axis=2)                              # iter 0 peeled: v == 0
        v = log_norm - _logsumexp(m_kn + u, axis=1)
        for _ in range(num_iters - 1):
            u = log_norm - _logsumexp(m_kn + v, axis=2)                      # (Bb, K, 1)
            v = log_norm - _logsumexp(m_kn + u, axis=1)                      # (Bb, 1, N)
    else:
        u = jnp.zeros((bb, k, 1), jnp.float32)
        v = jnp.zeros((bb, 1, n_pix), jnp.float32)
    log_p = m_kn + u + v - log_norm                                          # == log_P + log(n)

    inv_t = invt_ref[0]
    p = jnp.exp(log_p * inv_t) + jnp.exp(log_p)                              # (Bb, K, N) f32
    p_bf = p.astype(jnp.bfloat16)

    # ---- aggregation: natural (K, N) @ (N, D) per batch element, bf16 MXU, f32 acc
    agg = jnp.einsum("bkn,bnd->bkd", p_bf, f,
                     preferred_element_type=jnp.float32)                     # (Bb, K, D)
    agg = jnp.transpose(agg, (0, 2, 1))                                      # (Bb, D, K): D-major flatten order

    # ---- L2 normalization of the flattened D*K descriptor (order independent)
    sq = jnp.sum(jnp.sum(agg * agg, axis=2, keepdims=True), axis=1, keepdims=True)
    inv_nrm = lax.rsqrt(jnp.maximum(sq, 1e-24))                              # == 1/max(norm, 1e-12)
    o_ref[...] = (agg * inv_nrm).astype(o_ref.dtype)


# ---------------------------------------------------------------------------
# Block-size / VMEM planning (generation aware)
# ---------------------------------------------------------------------------

def _num_tensorcores_per_device():
    """Heuristic TC-per-device count; only used to decide whether splitting the
    grid for megacore is worthwhile.  Errs on the side of 1 (no split)."""
    try:
        kind = jax.devices()[0].device_kind.lower()
    except Exception:
        return 1
    if "lite" in kind or "v5e" in kind or "v6e" in kind or "v6 " in kind:
        return 1
    if any(tag in kind for tag in ("v4", "v5p", "v7", "7x", "tpu7")) or "v5" in kind:
        return 2
    return 1


def _vmem_capacity_bytes():
    try:
        return int(pltpu.get_tpu_info().vmem_capacity_bytes)
    except Exception:
        return 64 * 1024 * 1024  # conservative (v7x per-TC)


def _vmem_bytes_per_step(bb, n, c, hd2, d, k):
    """Rough per-grid-step VMEM working set (input/output blocks double-buffered)."""
    rows = bb * n
    x_blk = bb * c * n * 2 * 2             # bf16 input block, double-buffered
    xt = rows * c * (4 + 2)                # f32 transpose temp + bf16 matmul operand
    h = rows * hd2 * (4 + 2)               # f32 hidden + bf16 copy
    f = rows * d * (4 + 2)
    s = rows * k * 4
    sink = bb * k * n * 4 * 4              # m_kn / log_p / p + temporaries
    p_bf = bb * k * n * 2
    out = bb * d * k * 4 * 2
    w = (c * hd2 + (hd2 // 2) * (d + k)) * 2 * 2
    return x_blk + xt + h + f + s + sink + p_bf + out + w


def _pick_block_b(batch, n_pix, c, hd2, d, k, *, num_tc, vmem_budget, max_rows):
    """Largest divisor of `batch` with Bb*N <= max_rows and within the VMEM budget.
    Only keep >= num_tc grid steps when there is more than one TensorCore."""
    divisors = [q for q in range(1, batch + 1) if batch % q == 0]
    feasible = [q for q in divisors
                if q * n_pix <= max_rows
                and _vmem_bytes_per_step(q, n_pix, c, hd2, d, k) <= vmem_budget]
    if not feasible:
        feasible = [1]
    bb = max(feasible)
    if num_tc > 1 and batch // bb < num_tc:
        smaller = [q for q in feasible if batch // q >= num_tc]
        if smaller:
            bb = max(smaller)
    return bb


# ---------------------------------------------------------------------------
# Wrapper
# ---------------------------------------------------------------------------

def image_aggregation_forward(x_nchw, params, *, num_iters=3, reg=1.0, max_rows=4096):
    B, C, H, W = x_nchw.shape
    N = H * W
    # Keep NCHW in HBM: reshape (free) + bf16 cast only; the channels-last relayout
    # happens inside the kernel in VMEM (no extra XLA HBM round trip of the input).
    x = x_nchw.reshape(B, C, N).astype(jnp.bfloat16)

    # Fuse both first-layer head weights; fold 1/reg into the score head's second layer.
    w1 = jnp.concatenate([params["w1f"], params["w1s"]], axis=1).astype(jnp.bfloat16)   # (C, 2*Hd)
    b1 = jnp.concatenate([params["b1f"], params["b1s"]], axis=1).astype(jnp.float32)    # (1, 2*Hd)
    w2f = params["w2f"].astype(jnp.bfloat16)
    b2f = params["b2f"].astype(jnp.float32)
    w2s = (params["w2s"] / reg).astype(jnp.bfloat16)
    b2s = (params["b2s"] / reg).astype(jnp.float32)
    inv_t = (1.0 / params["temperature"]).reshape(1).astype(jnp.float32)

    Hd = params["w1f"].shape[1]           # multiple of 128 keeps the head split lane-aligned
    D = params["w2f"].shape[1]
    K = params["w2s"].shape[1]

    num_tc = _num_tensorcores_per_device()
    vmem_cap = _vmem_capacity_bytes()
    vmem_budget = int(vmem_cap * 0.6)

    Bb = _pick_block_b(B, N, C, 2 * Hd, D, K,
                       num_tc=num_tc, vmem_budget=vmem_budget, max_rows=max_rows)
    grid = (B // Bb,)
    est = _vmem_bytes_per_step(Bb, N, C, 2 * Hd, D, K)
    vmem_limit = int(min(vmem_cap * 0.9, max(32 * 1024 * 1024, 2 * est)))

    kernel = functools.partial(_image_agg_kernel, num_iters=num_iters)

    in_specs = [
        pl.BlockSpec((Bb, C, N), lambda b: (b, 0, 0)),        # x (channels-first), Bb images / step
        pl.BlockSpec((C, 2 * Hd), lambda b: (0, 0)),          # fused layer-1 weight
        pl.BlockSpec((1, 2 * Hd), lambda b: (0, 0)),          # fused layer-1 bias
        pl.BlockSpec((Hd, D), lambda b: (0, 0)),              # cluster_features layer-2 weight
        pl.BlockSpec((1, D), lambda b: (0, 0)),               # cluster_features layer-2 bias
        pl.BlockSpec((Hd, K), lambda b: (0, 0)),              # score layer-2 weight (pre-scaled 1/reg)
        pl.BlockSpec((1, K), lambda b: (0, 0)),               # score layer-2 bias (pre-scaled 1/reg)
        pl.BlockSpec(memory_space=pltpu.MemorySpace.SMEM),    # 1/temperature scalar
    ]
    out_spec = pl.BlockSpec((Bb, D, K), lambda b: (b, 0, 0))

    out_dk = pl.pallas_call(
        kernel,
        out_shape=jax.ShapeDtypeStruct((B, D, K), jnp.float32),
        grid_spec=pltpu.PrefetchScalarGridSpec(
            num_scalar_prefetch=0,
            grid=grid,
            in_specs=in_specs,
            out_specs=out_spec,
        ),
        compiler_params=pltpu.CompilerParams(
            dimension_semantics=("parallel",),
            vmem_limit_bytes=vmem_limit,
        ),
    )(x, w1, b1, w2f, b2f, w2s, b2s, inv_t)

    # (B, D, K) row-major == PyTorch's D-major flatten -> plain (free) reshape.
    return out_dk.reshape(B, D * K)


# ---------------------------------------------------------------------------
# Params / reference
# ---------------------------------------------------------------------------

def init_params(key, num_channels, num_clusters, cluster_dim, hidden, temperature=1.0):
    """Deterministic synthetic init (PyTorch-style uniform bounds); conv1x1 weights stored as (in, out)."""
    ks = jax.random.split(key, 8)

    def lin_w(k, fan_in, fan_out):
        bound = 1.0 / math.sqrt(fan_in)
        return jax.random.uniform(k, (fan_in, fan_out), jnp.float32, -bound, bound)

    def lin_b(k, fan_in, fan_out):
        bound = 1.0 / math.sqrt(fan_in)
        return jax.random.uniform(k, (1, fan_out), jnp.float32, -bound, bound)

    return {
        "w1f": lin_w(ks[0], num_channels, hidden),
        "b1f": lin_b(ks[1], num_channels, hidden),
        "w2f": lin_w(ks[2], hidden, cluster_dim),
        "b2f": lin_b(ks[3], hidden, cluster_dim),
        "w1s": lin_w(ks[4], num_channels, hidden),
        "b1s": lin_b(ks[5], num_channels, hidden),
        "w2s": lin_w(ks[6], hidden, num_clusters),
        "b2s": lin_b(ks[7], hidden, num_clusters),
        "temperature": jnp.asarray(temperature, jnp.float32),
    }


def reference_forward(x_nchw, params, num_iters=3, reg=1.0):
    """Pure-JAX f32 reference mirroring the PyTorch forward (eval mode)."""
    B, C, H, W = x_nchw.shape
    N = H * W
    x = jnp.transpose(x_nchw, (0, 2, 3, 1)).reshape(B, N, C).astype(jnp.float32)
    h = jnp.maximum(x @ params["w1f"] + params["b1f"], 0.0)
    f = h @ params["w2f"] + params["b2f"]                          # (B, N, D)
    h = jnp.maximum(x @ params["w1s"] + params["b1s"], 0.0)
    s = h @ params["w2s"] + params["b2s"]                          # (B, N, K)
    S = jnp.transpose(s, (0, 2, 1)) / reg                          # (B, K, N)
    log_norm = -jnp.log(jnp.float32(N))
    u = jnp.zeros((B, S.shape[1], 1), jnp.float32)
    v = jnp.zeros((B, 1, N), jnp.float32)
    for _ in range(num_iters):
        u = log_norm - jax.scipy.special.logsumexp(S + v, axis=2, keepdims=True)
        v = log_norm - jax.scipy.special.logsumexp(S + u, axis=1, keepdims=True)
    log_p = S + u + v - log_norm
    t = params["temperature"]
    p = jnp.exp(log_p / t) + jnp.exp(log_p)
    agg = jnp.einsum("bnd,bkn->bdk", f, p)
    flat = agg.reshape(B, -1)
    return flat / jnp.maximum(jnp.linalg.norm(flat, axis=-1, keepdims=True), 1e-12)


if __name__ == "__main__":
    # Small shapes consistent with the module's forward:
    # (batch=2, num_channels=64, H=W=8, hidden=128, cluster_dim=32, num_clusters=16)
    B, C, H, W = 2, 64, 8, 8
    num_clusters, cluster_dim, hidden = 16, 32, 128

    key = jax.random.PRNGKey(0)
    kx, kp = jax.random.split(key)
    x = jax.random.normal(kx, (B, C, H, W), jnp.float32)
    params = init_params(kp, C, num_clusters, cluster_dim, hidden, temperature=1.0)

    out = image_aggregation_forward(x, params)
    out = jax.block_until_ready(out)

    ref = reference_forward(x, params)
    assert out.shape == (B, cluster_dim * num_clusters), out.shape
    # bf16 MXU operands (heads + aggregation) -> relaxed tolerance vs. the f32 reference.
    err = float(jnp.max(jnp.abs(out - ref)))
    assert err < 2e-2, err
    print("KERNEL_OK")
</pallas_src>

<mosaic_0001>
module attributes {stable_mosaic.version = 11 : i64} {
  func.func @_image_agg_kernel(%arg0: i32, %arg1: memref<2x64x64xbf16, #tpu.memory_space<vmem>>, %arg2: memref<64x256xbf16, #tpu.memory_space<vmem>>, %arg3: memref<1x256xf32, #tpu.memory_space<vmem>>, %arg4: memref<128x32xbf16, #tpu.memory_space<vmem>>, %arg5: memref<1x32xf32, #tpu.memory_space<vmem>>, %arg6: memref<128x16xbf16, #tpu.memory_space<vmem>>, %arg7: memref<1x16xf32, #tpu.memory_space<vmem>>, %arg8: memref<1xf32, #tpu.memory_space<smem>>, %arg9: memref<2x32x16xf32, #tpu.memory_space<vmem>>) attributes {dimension_semantics = [#tpu.dimension_semantics<parallel>], iteration_bounds = array<i64: 1>, scalar_prefetch = 0 : i64, scratch_operands = 0 : i64, tpu.core_type = #tpu.core_type<tc>, window_params = [{transform_indices = @transform_0, window_bounds = array<i64: 2, 64, 64>}, {pipeline_mode = #tpu.pipeline_mode<synchronous>, transform_indices = @transform_1, window_bounds = array<i64: 64, 256>}, {pipeline_mode = #tpu.pipeline_mode<synchronous>, transform_indices = @transform_2, window_bounds = array<i64: 1, 256>}, {pipeline_mode = #tpu.pipeline_mode<synchronous>, transform_indices = @transform_3, window_bounds = array<i64: 128, 32>}, {pipeline_mode = #tpu.pipeline_mode<synchronous>, transform_indices = @transform_4, window_bounds = array<i64: 1, 32>}, {pipeline_mode = #tpu.pipeline_mode<synchronous>, transform_indices = @transform_5, window_bounds = array<i64: 128, 16>}, {pipeline_mode = #tpu.pipeline_mode<synchronous>, transform_indices = @transform_6, window_bounds = array<i64: 1, 16>}, {transform_indices = @transform_7, window_bounds = array<i64: 1>}, {transform_indices = @transform_8, window_bounds = array<i64: 2, 32, 16>}]} {
    %c0 = arith.constant 0 : index
    %c0_0 = arith.constant 0 : index
    %c0_1 = arith.constant 0 : index
    %0 = vector.load %arg1[%c0, %c0_0, %c0_1] : memref<2x64x64xbf16, #tpu.memory_space<vmem>>, vector<2x64x64xbf16>
    %1 = arith.extf %0 : vector<2x64x64xbf16> to vector<2x64x64xf32>
    %2 = tpu.transpose %1, [0, 2, 1] : vector<2x64x64xf32> -> vector<2x64x64xf32>
    %3 = vector.shape_cast %2 : vector<2x64x64xf32> to vector<128x64xf32>
    %4 = arith.truncf %3 : vector<128x64xf32> to vector<128x64xbf16>
    %c0_2 = arith.constant 0 : index
    %c0_3 = arith.constant 0 : index
    %5 = vector.load %arg2[%c0_2, %c0_3] : memref<64x256xbf16, #tpu.memory_space<vmem>>, vector<64x256xbf16>
    %cst = arith.constant dense<0.000000e+00> : vector<128x256xf32>
    %6 = tpu.matmul %4, %5, %cst {dimension_numbers = #tpu.dot_dimension_numbers<[1], [0], [0], [1], [0, 0, 1, 1], [], []>} : vector<128x64xbf16>, vector<64x256xbf16>, vector<128x256xf32> -> vector<128x256xf32>
    %c0_4 = arith.constant 0 : index
    %c0_5 = arith.constant 0 : index
    %7 = vector.load %arg3[%c0_4, %c0_5] : memref<1x256xf32, #tpu.memory_space<vmem>>, vector<1x256xf32>
    %8 = vector.broadcast %7 : vector<1x256xf32> to vector<128x256xf32>
    %9 = arith.addf %6, %8 : vector<128x256xf32>
    %cst_6 = arith.constant 0.000000e+00 : f32
    %10 = vector.broadcast %cst_6 : f32 to vector<128x256xf32>
    %11 = arith.maximumf %9, %10 : vector<128x256xf32>
    %12 = arith.truncf %11 : vector<128x256xf32> to vector<128x256xbf16>
    %13 = vector.extract_strided_slice %12 {offsets = [0, 0], sizes = [128, 128], strides = [1, 1]} : vector<128x256xbf16> to vector<128x128xbf16>
    %c0_7 = arith.constant 0 : index
    %c0_8 = arith.constant 0 : index
    %14 = vector.load %arg4[%c0_7, %c0_8] : memref<128x32xbf16, #tpu.memory_space<vmem>>, vector<128x32xbf16>
    %cst_9 = arith.constant dense<0.000000e+00> : vector<128x32xf32>
    %15 = tpu.matmul %13, %14, %cst_9 {dimension_numbers = #tpu.dot_dimension_numbers<[1], [0], [0], [1], [0, 0, 1, 1], [], []>} : vector<128x128xbf16>, vector<128x32xbf16>, vector<128x32xf32> -> vector<128x32xf32>
    %c0_10 = arith.constant 0 : index
    %c0_11 = arith.constant 0 : index
    %16 = vector.load %arg5[%c0_10, %c0_11] : memref<1x32xf32, #tpu.memory_space<vmem>>, vector<1x32xf32>
    %17 = vector.broadcast %16 : vector<1x32xf32> to vector<128x32xf32>
    %18 = arith.addf %15, %17 : vector<128x32xf32>
    %19 = vector.extract_strided_slice %12 {offsets = [0, 128], sizes = [128, 128], strides = [1, 1]} : vector<128x256xbf16> to vector<128x128xbf16>
    %c0_12 = arith.constant 0 : index
    %c0_13 = arith.constant 0 : index
    %20 = vector.load %arg6[%c0_12, %c0_13] : memref<128x16xbf16, #tpu.memory_space<vmem>>, vector<128x16xbf16>
    %cst_14 = arith.constant dense<0.000000e+00> : vector<128x16xf32>
    %21 = tpu.matmul %19, %20, %cst_14 {dimension_numbers = #tpu.dot_dimension_numbers<[1], [0], [0], [1], [0, 0, 1, 1], [], []>} : vector<128x128xbf16>, vector<128x16xbf16>, vector<128x16xf32> -> vector<128x16xf32>
    %c0_15 = arith.constant 0 : index
    %c0_16 = arith.constant 0 : index
    %22 = vector.load %arg7[%c0_15, %c0_16] : memref<1x16xf32, #tpu.memory_space<vmem>>, vector<1x16xf32>
    %23 = vector.broadcast %22 : vector<1x16xf32> to vector<128x16xf32>
    %24 = arith.addf %21, %23 : vector<128x16xf32>
    %25 = arith.truncf %18 : vector<128x32xf32> to vector<128x32xbf16>
    %26 = vector.shape_cast %25 : vector<128x32xbf16> to vector<2x64x32xbf16>
    %27 = vector.shape_cast %24 : vector<128x16xf32> to vector<2x64x16xf32>
    %28 = tpu.transpose %27, [0, 2, 1] : vector<2x64x16xf32> -> vector<2x16x64xf32>
    %cst_17 = arith.constant dense<0xFF800000> : vector<2x16xf32>
    %29 = vector.multi_reduction <maximumf>, %28, %cst_17 [2] : vector<2x16x64xf32> to vector<2x16xf32>
    %30 = vector.shape_cast %29 : vector<2x16xf32> to vector<2x16x1xf32>
    %31 = vector.broadcast %30 : vector<2x16x1xf32> to vector<2x16x64xf32>
    %32 = arith.subf %28, %31 : vector<2x16x64xf32>
    %33 = math.exp %32 : vector<2x16x64xf32>
    %cst_18 = arith.constant dense<0.000000e+00> : vector<2x16xf32>
    %34 = vector.multi_reduction <add>, %33, %cst_18 [2] : vector<2x16x64xf32> to vector<2x16xf32>
    %35 = vector.shape_cast %34 : vector<2x16xf32> to vector<2x16x1xf32>
    %36 = math.log %35 : vector<2x16x1xf32>
    %37 = arith.addf %30, %36 : vector<2x16x1xf32>
    %cst_19 = arith.constant -4.15888309 : f32
    %38 = vector.broadcast %cst_19 : f32 to vector<2x16x1xf32>
    %39 = arith.subf %38, %37 : vector<2x16x1xf32>
    %40 = vector.broadcast %39 : vector<2x16x1xf32> to vector<2x16x64xf32>
    %41 = arith.addf %28, %40 : vector<2x16x64xf32>
    %cst_20 = arith.constant dense<0xFF800000> : vector<2x64xf32>
    %42 = vector.multi_reduction <maximumf>, %41, %cst_20 [1] : vector<2x16x64xf32> to vector<2x64xf32>
    %43 = vector.shape_cast %42 : vector<2x64xf32> to vector<2x1x64xf32>
    %44 = vector.broadcast %43 : vector<2x1x64xf32> to vector<2x16x64xf32>
    %45 = arith.subf %41, %44 : vector<2x16x64xf32>
    %46 = math.exp %45 : vector<2x16x64xf32>
    %cst_21 = arith.constant dense<0.000000e+00> : vector<2x64xf32>
    %47 = vector.multi_reduction <add>, %46, %cst_21 [1] : vector<2x16x64xf32> to vector<2x64xf32>
    %48 = vector.shape_cast %47 : vector<2x64xf32> to vector<2x1x64xf32>
    %49 = math.log %48 : vector<2x1x64xf32>
    %50 = arith.addf %43, %49 : vector<2x1x64xf32>
    %cst_22 = arith.constant -4.15888309 : f32
    %51 = vector.broadcast %cst_22 : f32 to vector<2x1x64xf32>
    %52 = arith.subf %51, %50 : vector<2x1x64xf32>
    %53 = vector.broadcast %52 : vector<2x1x64xf32> to vector<2x16x64xf32>
    %54 = arith.addf %28, %53 : vector<2x16x64xf32>
    %cst_23 = arith.constant dense<0xFF800000> : vector<2x16xf32>
    %55 = vector.multi_reduction <maximumf>, %54, %cst_23 [2] : vector<2x16x64xf32> to vector<2x16xf32>
    %56 = vector.shape_cast %55 : vector<2x16xf32> to vector<2x16x1xf32>
    %57 = vector.broadcast %56 : vector<2x16x1xf32> to vector<2x16x64xf32>
    %58 = arith.subf %54, %57 : vector<2x16x64xf32>
    %59 = math.exp %58 : vector<2x16x64xf32>
    %cst_24 = arith.constant dense<0.000000e+00> : vector<2x16xf32>
    %60 = vector.multi_reduction <add>, %59, %cst_24 [2] : vector<2x16x64xf32> to vector<2x16xf32>
    %61 = vector.shape_cast %60 : vector<2x16xf32> to vector<2x16x1xf32>
    %62 = math.log %61 : vector<2x16x1xf32>
    %63 = arith.addf %56, %62 : vector<2x16x1xf32>
    %cst_25 = arith.constant -4.15888309 : f32
    %64 = vector.broadcast %cst_25 : f32 to vector<2x16x1xf32>
    %65 = arith.subf %64, %63 : vector<2x16x1xf32>
    %66 = vector.broadcast %65 : vector<2x16x1xf32> to vector<2x16x64xf32>
    %67 = arith.addf %28, %66 : vector<2x16x64xf32>
    %cst_26 = arith.constant dense<0xFF800000> : vector<2x64xf32>
    %68 = vector.multi_reduction <maximumf>, %67, %cst_26 [1] : vector<2x16x64xf32> to vector<2x64xf32>
    %69 = vector.shape_cast %68 : vector<2x64xf32> to vector<2x1x64xf32>
    %70 = vector.broadcast %69 : vector<2x1x64xf32> to vector<2x16x64xf32>
    %71 = arith.subf %67, %70 : vector<2x16x64xf32>
    %72 = math.exp %71 : vector<2x16x64xf32>
    %cst_27 = arith.constant dense<0.000000e+00> : vector<2x64xf32>
    %73 = vector.multi_reduction <add>, %72, %cst_27 [1] : vector<2x16x64xf32> to vector<2x64xf32>
    %74 = vector.shape_cast %73 : vector<2x64xf32> to vector<2x1x64xf32>
    %75 = math.log %74 : vector<2x1x64xf32>
    %76 = arith.addf %69, %75 : vector<2x1x64xf32>
    %cst_28 = arith.constant -4.15888309 : f32
    %77 = vector.broadcast %cst_28 : f32 to vector<2x1x64xf32>
    %78 = arith.subf %77, %76 : vector<2x1x64xf32>
    %79 = vector.broadcast %78 : vector<2x1x64xf32> to vector<2x16x64xf32>
    %80 = arith.addf %28, %79 : vector<2x16x64xf32>
    %cst_29 = arith.constant dense<0xFF800000> : vector<2x16xf32>
    %81 = vector.multi_reduction <maximumf>, %80, %cst_29 [2] : vector<2x16x64xf32> to vector<2x16xf32>
    %82 = vector.shape_cast %81 : vector<2x16xf32> to vector<2x16x1xf32>
    %83 = vector.broadcast %82 : vector<2x16x1xf32> to vector<2x16x64xf32>
    %84 = arith.subf %80, %83 : vector<2x16x64xf32>
    %85 = math.exp %84 : vector<2x16x64xf32>
    %cst_30 = arith.constant dense<0.000000e+00> : vector<2x16xf32>
    %86 = vector.multi_reduction <add>, %85, %cst_30 [2] : vector<2x16x64xf32> to vector<2x16xf32>
    %87 = vector.shape_cast %86 : vector<2x16xf32> to vector<2x16x1xf32>
    %88 = math.log %87 : vector<2x16x1xf32>
    %89 = arith.addf %82, %88 : vector<2x16x1xf32>
    %cst_31 = arith.constant -4.15888309 : f32
    %90 = vector.broadcast %cst_31 : f32 to vector<2x16x1xf32>
    %91 = arith.subf %90, %89 : vector<2x16x1xf32>
    %92 = vector.broadcast %91 : vector<2x16x1xf32> to vector<2x16x64xf32>
    %93 = arith.addf %28, %92 : vector<2x16x64xf32>
    %cst_32 = arith.constant dense<0xFF800000> : vector<2x64xf32>
    %94 = vector.multi_reduction <maximumf>, %93, %cst_32 [1] : vector<2x16x64xf32> to vector<2x64xf32>
    %95 = vector.shape_cast %94 : vector<2x64xf32> to vector<2x1x64xf32>
    %96 = vector.broadcast %95 : vector<2x1x64xf32> to vector<2x16x64xf32>
    %97 = arith.subf %93, %96 : vector<2x16x64xf32>
    %98 = math.exp %97 : vector<2x16x64xf32>
    %cst_33 = arith.constant dense<0.000000e+00> : vector<2x64xf32>
    %99 = vector.multi_reduction <add>, %98, %cst_33 [1] : vector<2x16x64xf32> to vector<2x64xf32>
    %100 = vector.shape_cast %99 : vector<2x64xf32> to vector<2x1x64xf32>
    %101 = math.log %100 : vector<2x1x64xf32>
    %102 = arith.addf %95, %101 : vector<2x1x64xf32>
    %cst_34 = arith.constant -4.15888309 : f32
    %103 = vector.broadcast %cst_34 : f32 to vector<2x1x64xf32>
    %104 = arith.subf %103, %102 : vector<2x1x64xf32>
    %105 = vector.broadcast %91 : vector<2x16x1xf32> to vector<2x16x64xf32>
    %106 = arith.addf %28, %105 : vector<2x16x64xf32>
    %107 = vector.broadcast %104 : vector<2x1x64xf32> to vector<2x16x64xf32>
    %108 = arith.addf %106, %107 : vector<2x16x64xf32>
    %cst_35 = arith.constant -4.15888309 : f32
    %109 = vector.broadcast %cst_35 : f32 to vector<2x16x64xf32>
    %110 = arith.subf %108, %109 : vector<2x16x64xf32>
    %c0_36 = arith.constant 0 : index
    %111 = memref.load %arg8[%c0_36] : memref<1xf32, #tpu.memory_space<smem>>
    %112 = vector.broadcast %111 : f32 to vector<2x16x64xf32>
    %113 = arith.mulf %110, %112 : vector<2x16x64xf32>
    %114 = math.exp %113 : vector<2x16x64xf32>
    %115 = math.exp %110 : vector<2x16x64xf32>
    %116 = arith.addf %114, %115 : vector<2x16x64xf32>
    %117 = arith.truncf %116 : vector<2x16x64xf32> to vector<2x16x64xbf16>
    "tpu.trace_start"() <{level = 10 : i32, message = "bkn,bnd->bkd"}> : () -> ()
    %cst_37 = arith.constant dense<0.000000e+00> : vector<2x16x32xf32>
    %118 = tpu.matmul %117, %26, %cst_37 {dimension_numbers = #tpu.dot_dimension_numbers<[2], [1], [1], [2], [0, 0, 0, 1, 1, 2], [0], [0]>} : vector<2x16x64xbf16>, vector<2x64x32xbf16>, vector<2x16x32xf32> -> vector<2x16x32xf32>
    "tpu.trace_stop"() : () -> ()
    %119 = tpu.transpose %118, [0, 2, 1] : vector<2x16x32xf32> -> vector<2x32x16xf32>
    %120 = arith.mulf %119, %119 : vector<2x32x16xf32>
    %cst_38 = arith.constant dense<0.000000e+00> : vector<2x32xf32>
    %121 = vector.multi_reduction <add>, %120, %cst_38 [2] : vector<2x32x16xf32> to vector<2x32xf32>
    %122 = vector.shape_cast %121 : vector<2x32xf32> to vector<2x32x1xf32>
    %cst_39 = arith.constant dense<0.000000e+00> : vector<2x1xf32>
    %123 = vector.multi_reduction <add>, %122, %cst_39 [1] : vector<2x32x1xf32> to vector<2x1xf32>
    %124 = vector.shape_cast %123 : vector<2x1xf32> to vector<2x1x1xf32>
    %cst_40 = arith.constant 1.000000e-24 : f32
    %125 = vector.broadcast %cst_40 : f32 to vector<2x1x1xf32>
    %126 = arith.maximumf %124, %125 : vector<2x1x1xf32>
    %127 = math.rsqrt %126 : vector<2x1x1xf32>
    %128 = vector.broadcast %127 : vector<2x1x1xf32> to vector<2x32x16xf32>
    %129 = arith.mulf %119, %128 : vector<2x32x16xf32>
    %c0_41 = arith.constant 0 : index
    %c0_42 = arith.constant 0 : index
    %c0_43 = arith.constant 0 : index
    %130 = vector.load %arg9[%c0_41, %c0_42, %c0_43] : memref<2x32x16xf32, #tpu.memory_space<vmem>>, vector<2x32x16xf32>
    tpu.vector_store %arg9[%c0_41, %c0_42, %c0_43], %129 {strides = array<i32>} : memref<2x32x16xf32, #tpu.memory_space<vmem>>, vector<2x32x16xf32>,
    return
  }
  func.func @transform_0(%arg0: i32) -> (i32, i32, i32) {
    %c0_i32 = arith.constant 0 : i32
    %c0_i32_0 = arith.constant 0 : i32
    %c0_i32_1 = arith.constant 0 : i32
    return %arg0, %c0_i32, %c0_i32_0 : i32, i32, i32
  }
  func.func @transform_1(%arg0: i32) -> (i32, i32) {
    %c0_i32 = arith.constant 0 : i32
    %c0_i32_0 = arith.constant 0 : i32
    %c0_i32_1 = arith.constant 0 : i32
    return %c0_i32, %c0_i32_0 : i32, i32
  }
  func.func @transform_2(%arg0: i32) -> (i32, i32) {
    %c0_i32 = arith.constant 0 : i32
    %c0_i32_0 = arith.constant 0 : i32
    %c0_i32_1 = arith.constant 0 : i32
    return %c0_i32, %c0_i32_0 : i32, i32
  }
  func.func @transform_3(%arg0: i32) -> (i32, i32) {
    %c0_i32 = arith.constant 0 : i32
    %c0_i32_0 = arith.constant 0 : i32
    %c0_i32_1 = arith.constant 0 : i32
    return %c0_i32, %c0_i32_0 : i32, i32
  }
  func.func @transform_4(%arg0: i32) -> (i32, i32) {
    %c0_i32 = arith.constant 0 : i32
    %c0_i32_0 = arith.constant 0 : i32
    %c0_i32_1 = arith.constant 0 : i32
    return %c0_i32, %c0_i32_0 : i32, i32
  }
  func.func @transform_5(%arg0: i32) -> (i32, i32) {
    %c0_i32 = arith.constant 0 : i32
    %c0_i32_0 = arith.constant 0 : i32
    %c0_i32_1 = arith.constant 0 : i32
    return %c0_i32, %c0_i32_0 : i32, i32
  }
  func.func @transform_6(%arg0: i32) -> (i32, i32) {
    %c0_i32 = arith.constant 0 : i32
    %c0_i32_0 = arith.constant 0 : i32
    %c0_i32_1 = arith.constant 0 : i32
    return %c0_i32, %c0_i32_0 : i32, i32
  }
  func.func @transform_7(%arg0: i32) -> i32 {
    %c0_i32 = arith.constant 0 : i32
    %c0_i32_0 = arith.constant 0 : i32
    return %c0_i32 : i32
  }
  func.func @transform_8(%arg0: i32) -> (i32, i32, i32) {
    %c0_i32 = arith.constant 0 : i32
    %c0_i32_0 = arith.constant 0 : i32
    %c0_i32_1 = arith.constant 0 : i32
    return %arg0, %c0_i32, %c0_i32_0 : i32, i32, i32
  }
}

</mosaic_0001>

<bundles_post_ra>
// kernel: tpu_custom_call.1
= control target key start
LH: loop header
LB: loop body
LE: loop exit
PB: predicated region body
PF: predicated region fallthrough
CT: control target
= control target key end

     0   :  { %vm189_vm0 = vcmask 523264   ;;  %vm1300_vm1 = vcmask 130048   ;;  %s2132_s0 = inlined_call_operand.vmem [shape: bf16[2,64,64], index: 0, kind: input, shape index: {}]   ;;  %s2133_s1 = inlined_call_operand.vmem [shape: bf16[64,256], index: 1, kind: input, shape index: {}]   ;;  %s2134_s3 = inlined_call_operand.vmem [shape: bf16[128,32], index: 3, kind: input, shape index: {}]   ;;  %s2135_s5 = inlined_call_operand.vmem [shape: bf16[128,16], index: 5, kind: input, shape index: {}]   ;;  %s2136_s2 = inlined_call_operand.vmem [shape: f32[1,256], index: 2, kind: input, shape index: {}]   ;;  %s2137_s4 = inlined_call_operand.vmem [shape: f32[1,32], index: 4, kind: input, shape index: {}]   ;;  %s2138_s6 = inlined_call_operand.vmem [shape: f32[1,16], index: 6, kind: input, shape index: {}]   ;;  %s2139_s7 = inlined_call_operand.<no memory space> [shape: f32[1], index: 7, kind: input, shape index: {}]   ;;  %s2140_s8 = inlined_call_operand.vmem [shape: f32[2,32,16], index: 8, kind: output, shape index: {}]  }
   0x1   :  { %v1528_v0 = vld [vmem:[%s2132_s0] sm:$0xff]   ;;  %v1559_v3 = vld [vmem:[%s2132_s0 + $0x8] sm:$0xff]   ;;  %v1560_v9 = vld [vmem:[%s2132_s0 + $0x10] sm:$0xff]  }
   0x2   :  { %v1529_v1 = vunpack.c.l.bf16 %v1528_v0  ;;  %v1530_v2 = vunpack.c.h.bf16 %v1528_v0  ;;  %v1533_v4 = vunpack.c.l.bf16 %v1559_v3  ;;  %v1562_v5 = vld [vmem:[%s2132_s0 + $0x20] sm:$0xff]   ;;  %v1534_v7 = vunpack.c.h.bf16 %v1559_v3  ;;  %v1563_v11 = vld [vmem:[%s2132_s0 + $0x28] sm:$0xff]   ;;  %v1561_v15 = vld [vmem:[%s2132_s0 + $0x18] sm:$0xff]  }
   0x3   :  { %v1545_v6 = vunpack.c.l.bf16 %v1562_v5  ;;  %v1546_v8 = vunpack.c.h.bf16 %v1562_v5  ;;  %v1537_v10 = vunpack.c.l.bf16 %v1560_v9  ;;  %v1549_v12 = vunpack.c.l.bf16 %v1563_v11  ;;  %v1564_v16 = vld [vmem:[%s2132_s0 + $0x30] sm:$0xff]   ;;  %v1510_v18 = vld [vmem:[%s2133_s1 + $0x34] sm:$0xf0]  ;;  %v1413_v22 = vld [vmem:[%s2133_s1 + $0x38] sm:$0xf0] }
   0x4   :  { %63 = vxpose.xlu0.b32.start [1/8] (short) (narrow) %v1529_v1, 64  ;;  %v1538_v13 = vunpack.c.h.bf16 %v1560_v9  ;;  %v1550_v14 = vunpack.c.h.bf16 %v1563_v11  ;;  %v1411_v17 = vld [vmem:[%s2133_s1 + $0x30] sm:$0xf]  ;;  %v1541_v19 = vunpack.c.l.bf16 %v1561_v15  ;;  %v1509_v21 = vld [vmem:[%s2133_s1 + $0x34] sm:$0xf]  ;;  %v1553_v29 = vunpack.c.l.bf16 %v1564_v16  ;;  %v1565_v33 = vld [vmem:[%s2132_s0 + $0x38] sm:$0xff]  }
   0x5   :  { %95 = vxpose.xlu1.b32.start [1/8] (short) (narrow) %v1545_v6, 64  ;;  %v1412_v20 = vor.u32 %v1510_v18, %v1411_v17  ;;  %v1403_v23 = vld [vmem:[%s2133_s1 + $0x20] sm:$0xf]  ;;  %v1416_v24 = vor.u32 %v1509_v21, %v1413_v22  ;;  %v1508_v25 = vld [vmem:[%s2133_s1 + $0x24] sm:$0xf0]  ;;  %v1542_v31 = vunpack.c.h.bf16 %v1561_v15  ;;  %v1554_v32 = vunpack.c.h.bf16 %v1564_v16  ;;  %v1518_v3 = vld [vmem:[%s2134_s3 + $0x38] sm:$0xff] }
   0x6   :  { %v1507_v26 = vld [vmem:[%s2133_s1 + $0x24] sm:$0xf]  ;;  %v1405_v27 = vld [vmem:[%s2133_s1 + $0x28] sm:$0xf0]  ;;  %v1404_v28 = vor.u32 %v1508_v25, %v1403_v23  ;;  %v1557_v34 = vunpack.c.l.bf16 %v1565_v33  ;;  %v1558_v35 = vunpack.c.h.bf16 %v1565_v33  ;;  %v1395_v36 = vld [vmem:[%s2133_s1 + $0x10] sm:$0xf]  ;;  %476 = vmatpush.bf16.msra.mxu2 %v1518_v3 }
   0x7   :  { %218 = vmatpush.bf16.msra.mxu0 %v1412_v20  ;;  %267 = vmatpush.bf16.msra.mxu1 %v1416_v24  ;;  %v1408_v30 = vor.u32 %v1507_v26, %v1405_v27  ;;  %v1506_v37 = vld [vmem:[%s2133_s1 + $0x14] sm:$0xf0]  ;;  %v1505_v38 = vld [vmem:[%s2133_s1 + $0x14] sm:$0xf]  ;;  %v1397_v40 = vld [vmem:[%s2133_s1 + $0x18] sm:$0xf0] }
   0x8   :  { %v1396_v39 = vor.u32 %v1506_v37, %v1395_v36  ;;  %v1387_v41 = vld [vmem:[%s2133_s1] sm:$0xf]  ;;  %v1504_v42 = vld [vmem:[%s2133_s1 + $0x4] sm:$0xf0]  ;;  %v1400_v43 = vor.u32 %v1505_v38, %v1397_v40  ;;  %v1503_v44 = vld [vmem:[%s2133_s1 + $0x4] sm:$0xf] }
   0x9   :  { %v1389_v45 = vld [vmem:[%s2133_s1 + $0x8] sm:$0xf0]  ;;  %v1388_v46 = vor.u32 %v1504_v42, %v1387_v41  ;;  %v1517_v5 = vld [vmem:[%s2134_s3 + $0x30] sm:$0xff]  ;;  %v1523_v11 = vld [vmem:[%s2135_s5 + $0x20] sm:$0xff] }
   0xa   :  { %v1392_v47 = vor.u32 %v1503_v44, %v1389_v45  ;;  %v1525_v6 = vld [vmem:[%s2135_s5 + $0x30] sm:$0xff]  ;;  %477 = vmatpush.bf16.msra.mxu2 %v1517_v5  ;;  %v1512_v18 = vld [vmem:[%s2134_s3 + $0x8] sm:$0xff]  ;;  %v1511_v21 = vld [vmem:[%s2134_s3] sm:$0xff] }
   0xb   :  { %219 = vmatpush.bf16.msra.mxu0 %v1404_v28  ;;  %268 = vmatpush.bf16.msra.mxu1 %v1408_v30  ;;  %v1513_v16 = vld [vmem:[%s2134_s3 + $0x10] sm:$0xff]  ;;  %v1519_v22 = vld [vmem:[%s2135_s5] sm:$0xff] }
   0xc   :  { %64 = vxpose.xlu0.b32.cont [2/8] (short) (narrow) %v1530_v2, 64  ;;  %v1521_v17 = vld [vmem:[%s2135_s5 + $0x10] sm:$0xff]  ;;  %v143_v24 = vld [vmem:[%s2136_s2] sm:$0x3] }
   0xd   :  { %96 = vxpose.xlu1.b32.cont [2/8] (short) (narrow) %v1546_v8, 64  ;;  %v1524_v8 = vld [vmem:[%s2135_s5 + $0x28] sm:$0xff]  ;;  %v1857_v25 = vperm.slane %v143_v24, 0  ;;  %v1859_v26 = vperm.slane %v143_v24, 1 }
   0xf   :  { %220 = vmatpush.bf16.msra.mxu0 %v1396_v39  ;;  %269 = vmatpush.bf16.msra.mxu1 %v1400_v43 }
  0x13   :  { %221 = vmatpush.bf16.msra.mxu0 %v1388_v46  ;;  %270 = vmatpush.bf16.msra.mxu1 %v1392_v47 }
  0x14   :  { %65 = vxpose.xlu0.b32.cont [3/8] (short) (narrow) %v1533_v4, 64  ;;  %v1526_v4 = vld [vmem:[%s2135_s5 + $0x38] sm:$0xff] }
  0x15   :  { %97 = vxpose.xlu1.b32.cont [3/8] (short) (narrow) %v1549_v12, 64  ;;  %625 = vmatpush.bf16.msra.mxu3 %v1526_v4 }
  0x19   :  { %626 = vmatpush.bf16.msra.mxu3 %v1525_v6 }
  0x1c   :  { %66 = vxpose.xlu0.b32.cont [4/8] (short) (narrow) %v1534_v7, 64  ;;  %v1516_v7 = vld [vmem:[%s2134_s3 + $0x28] sm:$0xff] }
  0x1d   :  { %98 = vxpose.xlu1.b32.cont [4/8] (short) (narrow) %v1550_v14, 64  ;;  %478 = vmatpush.bf16.msra.mxu2 %v1516_v7  ;;  %v1522_v14 = vld [vmem:[%s2135_s5 + $0x18] sm:$0xff] }
  0x1e   :  { %627 = vmatpush.bf16.msra.mxu3 %v1524_v8 }
  0x22   :  { %628 = vmatpush.bf16.msra.mxu3 %v1523_v11 }
  0x24   :  { %67 = vxpose.xlu0.b32.cont [5/8] (short) (narrow) %v1537_v10, 64  ;;  %v1515_v10 = vld [vmem:[%s2134_s3 + $0x20] sm:$0xff] }
  0x25   :  { %99 = vxpose.xlu1.b32.cont [5/8] (short) (narrow) %v1553_v29, 64  ;;  %479 = vmatpush.bf16.msra.mxu2 %v1515_v10 }
  0x26   :  { %629 = vmatpush.bf16.msra.mxu3 %v1522_v14 }
  0x2a   :  { %630 = vmatpush.bf16.msra.mxu3 %v1521_v17 }
  0x2c   :  { %68 = vxpose.xlu0.b32.cont [6/8] (short) (narrow) %v1538_v13, 64  ;;  %v1514_v13 = vld [vmem:[%s2134_s3 + $0x18] sm:$0xff] }
  0x2d   :  { %100 = vxpose.xlu1.b32.cont [6/8] (short) (narrow) %v1554_v32, 64  ;;  %480 = vmatpush.bf16.msra.mxu2 %v1514_v13 }
  0x31   :  { %481 = vmatpush.bf16.msra.mxu2 %v1513_v16 }
  0x34   :  { %69 = vxpose.xlu0.b32.cont [7/8] (short) (narrow) %v1541_v19, 64  ;;  %v1520_v19 = vld [vmem:[%s2135_s5 + $0x8] sm:$0xff] }
  0x35   :  { %101 = vxpose.xlu1.b32.cont [7/8] (short) (narrow) %v1557_v34, 64  ;;  %482 = vmatpush.bf16.msra.mxu2 %v1512_v18 }
  0x36   :  { %631 = vmatpush.bf16.msra.mxu3 %v1520_v19 }
  0x39   :  { %483 = vmatpush.bf16.msra.mxu2 %v1511_v21 }
  0x3a   :  { %632 = vmatpush.bf16.msra.mxu3 %v1519_v22 }
  0x3c   :  { %70 = vxpose.xlu0.b32.end [8/8] (short) (narrow) %v1542_v31, 64 }
  0x3d   :  { %102 = vxpose.xlu1.b32.end [8/8] (short) (narrow) %v1558_v35, 64 }
  0xa8   :  { %v79_v48 = vpop.trf.xlu0 }
  0xa9   :  { %v111_v58 = vpop.trf.xlu1 }
  0xb0   :  { %v80_v49 = vpop.trf.xlu0 }
  0xb1   :  { %v127_v50 = vpack.c.bf16 %v80_v49, %v79_v48  ;;  %v112_v61 = vpop.trf.xlu1 }
  0xb2   :  { %v131_v63 = vpack.c.bf16 %v112_v61, %v111_v58 }
  0xb3   :  { %1417 = vmatmul.msk.bf16.vlgmr.msra.gmra.mxu0 %vm189_vm0, %v127_v50  ;;  %1425 = vmatmul.msk.bf16.vlgmr.msra.gmra.mxu1 %vm189_vm0, %v127_v50 }
  0xb8   :  { %v81_v51 = vpop.trf.xlu0 }
  0xb9   :  { %v113_v62 = vpop.trf.xlu1 }
  0xc0   :  { %v82_v52 = vpop.trf.xlu0 }
  0xc1   :  { %v128_v53 = vpack.c.bf16 %v82_v52, %v81_v51  ;;  %v114_v0 = vpop.trf.xlu1 }
  0xc2   :  { %v132_v2 = vpack.c.bf16 %v114_v0, %v113_v62 }
  0xc3   :  { %1418 = vmatmul.msk.bf16.gmra.mxu0 %vm189_vm0, %v128_v53  ;;  %1426 = vmatmul.msk.bf16.gmra.mxu1 %vm189_vm0, %v128_v53 }
  0xc8   :  { %v83_v54 = vpop.trf.xlu0 }
  0xc9   :  { %v115_v1 = vpop.trf.xlu1 }
  0xd0   :  { %v84_v55 = vpop.trf.xlu0 }
  0xd1   :  { %v129_v56 = vpack.c.bf16 %v84_v55, %v83_v54  ;;  %v116_v9 = vpop.trf.xlu1 }
  0xd2   :  { %v133_v12 = vpack.c.bf16 %v116_v9, %v115_v1 }
  0xd3   :  { %1419 = vmatmul.msk.bf16.gmra.mxu0 %vm189_vm0, %v129_v56  ;;  %1427 = vmatmul.msk.bf16.gmra.mxu1 %vm189_vm0, %v129_v56 }
  0xd8   :  { %v85_v57 = vpop.trf.xlu0 }
  0xd9   :  { %v117_v15 = vpop.trf.xlu1 }
  0xe0   :  { %v86_v59 = vpop.trf.xlu0 }
  0xe1   :  { %v130_v60 = vpack.c.bf16 %v86_v59, %v85_v57  ;;  %v118_v20 = vpop.trf.xlu1 }
  0xe2   :  { %v134_v23 = vpack.c.bf16 %v118_v20, %v117_v15 }
  0xe3   :  { %1420 = vmatmul.msk.bf16.gmra.mxu0 %vm189_vm0, %v130_v60  ;;  %1428 = vmatmul.msk.bf16.gmra.mxu1 %vm189_vm0, %v130_v60 }
  0xf3   :  { %1421 = vmatmul.msk.bf16.gmra.mxu0 %vm189_vm0, %v131_v63  ;;  %1429 = vmatmul.msk.bf16.gmra.mxu1 %vm189_vm0, %v131_v63 }
 0x103   :  { %1422 = vmatmul.msk.bf16.gmra.mxu0 %vm189_vm0, %v132_v2  ;;  %1430 = vmatmul.msk.bf16.gmra.mxu1 %vm189_vm0, %v132_v2 }
 0x113   :  { %1423 = vmatmul.msk.bf16.gmra.mxu0 %vm189_vm0, %v133_v12  ;;  %1431 = vmatmul.msk.bf16.gmra.mxu1 %vm189_vm0, %v133_v12 }
 0x123   :  { %1424 = vmatmul.msk.bf16.gmra.mxu0 %vm189_vm0, %v134_v23  ;;  %1432 = vmatmul.msk.bf16.gmra.mxu1 %vm189_vm0, %v134_v23 }
 0x130   :  { %v223_v27 = vpop.f32.mrf.mxu0  ;;  %v272_v28 = vpop.f32.mrf.mxu1 }
 0x131   :  { %v224_v29 = vadd.f32 %v223_v27, %v1857_v25  ;;  %v273_v30 = vadd.f32 %v272_v28, %v1859_v26 }
 0x133   :  { %v312_v31 = vmax.f32 %v224_v29, 0.0  ;;  %v313_v32 = vmax.f32 %v273_v30, 0.0 }
 0x135   :  { %v344_v37 = vpack.c.bf16 %v313_v32, %v312_v31 }
 0x137   :  { %v396_v41 = vunpack.c.l.b16 %v344_v37  ;;  %v545_v43 = vunpack.c.h.b16 %v344_v37 }
 0x138   :  { %v225_v33 = vpop.f32.mrf.mxu0  ;;  %v274_v34 = vpop.f32.mrf.mxu1 }
 0x139   :  { %v226_v35 = vadd.f32 %v225_v33, %v1857_v25  ;;  %v275_v36 = vadd.f32 %v274_v34, %v1859_v26 }
 0x13b   :  { %v314_v38 = vmax.f32 %v226_v35, 0.0  ;;  %v315_v39 = vmax.f32 %v275_v36, 0.0 }
 0x13d   :  { %v345_v40 = vpack.c.bf16 %v315_v39, %v314_v38 }
 0x13f   :  { %v397_v42 = vunpack.c.l.b16 %v345_v40  ;;  %v546_v44 = vunpack.c.h.b16 %v345_v40 }
 0x140   :  { %v228_v45 = vpop.f32.mrf.mxu0  ;;  %v277_v46 = vpop.f32.mrf.mxu1 }
 0x141   :  { %v412_v47 = vpack.c.b16 %v397_v42, %v396_v41  ;;  %v561_v48 = vpack.c.b16 %v546_v44, %v545_v43  ;;  %v229_v49 = vadd.f32 %v228_v45, %v1857_v25  ;;  %v278_v50 = vadd.f32 %v277_v46, %v1859_v26 }
 0x143   :  { %484 = vmatmul.bf16.vlgmr.msra.gmra.mxu2 %v412_v47  ;;  %633 = vmatmul.bf16.vlgmr.msra.gmra.mxu3 %v561_v48  ;;  %v316_v51 = vmax.f32 %v229_v49, 0.0  ;;  %v317_v52 = vmax.f32 %v278_v50, 0.0 }
 0x145   :  { %v346_v57 = vpack.c.bf16 %v317_v52, %v316_v51 }
 0x147   :  { %v398_v61 = vunpack.c.l.b16 %v346_v57  ;;  %v547_v63 = vunpack.c.h.b16 %v346_v57 }
 0x148   :  { %v230_v53 = vpop.f32.mrf.mxu0  ;;  %v279_v54 = vpop.f32.mrf.mxu1 }
 0x149   :  { %v231_v55 = vadd.f32 %v230_v53, %v1857_v25  ;;  %v280_v56 = vadd.f32 %v279_v54, %v1859_v26 }
 0x14b   :  { %v318_v58 = vmax.f32 %v231_v55, 0.0  ;;  %v319_v59 = vmax.f32 %v280_v56, 0.0 }
 0x14d   :  { %v347_v60 = vpack.c.bf16 %v319_v59, %v318_v58 }
 0x14f   :  { %v399_v62 = vunpack.c.l.b16 %v347_v60  ;;  %v548_v0 = vunpack.c.h.b16 %v347_v60 }
 0x150   :  { %v233_v1 = vpop.f32.mrf.mxu0  ;;  %v282_v2 = vpop.f32.mrf.mxu1 }
 0x151   :  { %v413_v3 = vpack.c.b16 %v399_v62, %v398_v61  ;;  %v562_v4 = vpack.c.b16 %v548_v0, %v547_v63  ;;  %v234_v5 = vadd.f32 %v233_v1, %v1857_v25  ;;  %v283_v6 = vadd.f32 %v282_v2, %v1859_v26 }
 0x153   :  { %489 = vmatmul.bf16.gmra.mxu2 %v413_v3  ;;  %638 = vmatmul.bf16.gmra.mxu3 %v562_v4  ;;  %v320_v7 = vmax.f32 %v234_v5, 0.0  ;;  %v321_v8 = vmax.f32 %v283_v6, 0.0 }
 0x155   :  { %v348_v13 = vpack.c.bf16 %v321_v8, %v320_v7 }
 0x157   :  { %v400_v17 = vunpack.c.l.b16 %v348_v13  ;;  %v549_v19 = vunpack.c.h.b16 %v348_v13 }
 0x158   :  { %v235_v9 = vpop.f32.mrf.mxu0  ;;  %v284_v10 = vpop.f32.mrf.mxu1 }
 0x159   :  { %v236_v11 = vadd.f32 %v235_v9, %v1857_v25  ;;  %v285_v12 = vadd.f32 %v284_v10, %v1859_v26 }
 0x15b   :  { %v322_v14 = vmax.f32 %v236_v11, 0.0  ;;  %v323_v15 = vmax.f32 %v285_v12, 0.0 }
 0x15d   :  { %v349_v16 = vpack.c.bf16 %v323_v15, %v322_v14 }
 0x15f   :  { %v401_v18 = vunpack.c.l.b16 %v349_v16  ;;  %v550_v20 = vunpack.c.h.b16 %v349_v16 }
 0x160   :  { %v238_v21 = vpop.f32.mrf.mxu0  ;;  %v287_v22 = vpop.f32.mrf.mxu1 }
 0x161   :  { %v414_v23 = vpack.c.b16 %v401_v18, %v400_v17  ;;  %v563_v24 = vpack.c.b16 %v550_v20, %v549_v19  ;;  %v239_v27 = vadd.f32 %v238_v21, %v1857_v25  ;;  %v288_v28 = vadd.f32 %v287_v22, %v1859_v26 }
 0x163   :  { %494 = vmatmul.bf16.gmra.mxu2 %v414_v23  ;;  %643 = vmatmul.bf16.gmra.mxu3 %v563_v24  ;;  %v324_v29 = vmax.f32 %v239_v27, 0.0  ;;  %v325_v30 = vmax.f32 %v288_v28, 0.0 }
 0x165   :  { %v350_v35 = vpack.c.bf16 %v325_v30, %v324_v29 }
 0x167   :  { %v402_v39 = vunpack.c.l.b16 %v350_v35  ;;  %v551_v41 = vunpack.c.h.b16 %v350_v35 }
 0x168   :  { %v240_v31 = vpop.f32.mrf.mxu0  ;;  %v289_v32 = vpop.f32.mrf.mxu1 }
 0x169   :  { %v241_v33 = vadd.f32 %v240_v31, %v1857_v25  ;;  %v290_v34 = vadd.f32 %v289_v32, %v1859_v26 }
 0x16b   :  { %v326_v36 = vmax.f32 %v241_v33, 0.0  ;;  %v327_v37 = vmax.f32 %v290_v34, 0.0 }
 0x16d   :  { %v351_v38 = vpack.c.bf16 %v327_v37, %v326_v36 }
 0x16f   :  { %v403_v40 = vunpack.c.l.b16 %v351_v38  ;;  %v552_v42 = vunpack.c.h.b16 %v351_v38 }
 0x170   :  { %v243_v43 = vpop.f32.mrf.mxu0  ;;  %v292_v44 = vpop.f32.mrf.mxu1 }
 0x171   :  { %v415_v45 = vpack.c.b16 %v403_v40, %v402_v39  ;;  %v564_v46 = vpack.c.b16 %v552_v42, %v551_v41  ;;  %v244_v47 = vadd.f32 %v243_v43, %v1857_v25  ;;  %v293_v48 = vadd.f32 %v292_v44, %v1859_v26 }
 0x173   :  { %499 = vmatmul.bf16.gmra.mxu2 %v415_v45  ;;  %648 = vmatmul.bf16.gmra.mxu3 %v564_v46  ;;  %v328_v49 = vmax.f32 %v244_v47, 0.0  ;;  %v329_v50 = vmax.f32 %v293_v48, 0.0 }
 0x175   :  { %v352_v55 = vpack.c.bf16 %v329_v50, %v328_v49 }
 0x177   :  { %v404_v59 = vunpack.c.l.b16 %v352_v55  ;;  %v553_v61 = vunpack.c.h.b16 %v352_v55 }
 0x178   :  { %v245_v51 = vpop.f32.mrf.mxu0  ;;  %v294_v52 = vpop.f32.mrf.mxu1 }
 0x179   :  { %v246_v53 = vadd.f32 %v245_v51, %v1857_v25  ;;  %v295_v54 = vadd.f32 %v294_v52, %v1859_v26 }
 0x17b   :  { %v330_v56 = vmax.f32 %v246_v53, 0.0  ;;  %v331_v57 = vmax.f32 %v295_v54, 0.0 }
 0x17d   :  { %v353_v58 = vpack.c.bf16 %v331_v57, %v330_v56 }
 0x17f   :  { %v405_v60 = vunpack.c.l.b16 %v353_v58  ;;  %v554_v62 = vunpack.c.h.b16 %v353_v58 }
 0x180   :  { %v248_v63 = vpop.f32.mrf.mxu0  ;;  %v297_v0 = vpop.f32.mrf.mxu1 }
 0x181   :  { %v416_v1 = vpack.c.b16 %v405_v60, %v404_v59  ;;  %v565_v2 = vpack.c.b16 %v554_v62, %v553_v61  ;;  %v249_v3 = vadd.f32 %v248_v63, %v1857_v25  ;;  %v298_v4 = vadd.f32 %v297_v0, %v1859_v26  ;;  %v1896_v63 = vld [vmem:[%s2138_s6] ss:$0 sm:$0xff] }
 0x183   :  { %504 = vmatmul.bf16.gmra.mxu2 %v416_v1  ;;  %653 = vmatmul.bf16.gmra.mxu3 %v565_v2  ;;  %v332_v5 = vmax.f32 %v249_v3, 0.0  ;;  %v333_v6 = vmax.f32 %v298_v4, 0.0 }
 0x185   :  { %v354_v11 = vpack.c.bf16 %v333_v6, %v332_v5 }
 0x187   :  { %v406_v15 = vunpack.c.l.b16 %v354_v11  ;;  %v555_v17 = vunpack.c.h.b16 %v354_v11 }
 0x188   :  { %v250_v7 = vpop.f32.mrf.mxu0  ;;  %v299_v8 = vpop.f32.mrf.mxu1 }
 0x189   :  { %v251_v9 = vadd.f32 %v250_v7, %v1857_v25  ;;  %v300_v10 = vadd.f32 %v299_v8, %v1859_v26 }
 0x18b   :  { %v334_v12 = vmax.f32 %v251_v9, 0.0  ;;  %v335_v13 = vmax.f32 %v300_v10, 0.0 }
 0x18d   :  { %v355_v14 = vpack.c.bf16 %v335_v13, %v334_v12 }
 0x18f   :  { %v407_v16 = vunpack.c.l.b16 %v355_v14  ;;  %v556_v18 = vunpack.c.h.b16 %v355_v14 }
 0x190   :  { %v253_v19 = vpop.f32.mrf.mxu0  ;;  %v302_v20 = vpop.f32.mrf.mxu1 }
 0x191   :  { %v417_v21 = vpack.c.b16 %v407_v16, %v406_v15  ;;  %v566_v22 = vpack.c.b16 %v556_v18, %v555_v17  ;;  %v254_v23 = vadd.f32 %v253_v19, %v1857_v25  ;;  %v303_v24 = vadd.f32 %v302_v20, %v1859_v26  ;;  %v1908_v19 = vld [vmem:[%s2137_s4] ss:$0 sm:$0xff] }
 0x193   :  { %509 = vmatmul.bf16.gmra.mxu2 %v417_v21  ;;  %658 = vmatmul.bf16.gmra.mxu3 %v566_v22  ;;  %v336_v27 = vmax.f32 %v254_v23, 0.0  ;;  %v337_v28 = vmax.f32 %v303_v24, 0.0 }
 0x195   :  { %v356_v33 = vpack.c.bf16 %v337_v28, %v336_v27 }
 0x197   :  { %v408_v37 = vunpack.c.l.b16 %v356_v33  ;;  %v557_v39 = vunpack.c.h.b16 %v356_v33 }
 0x198   :  { %v255_v29 = vpop.f32.mrf.mxu0  ;;  %v304_v30 = vpop.f32.mrf.mxu1 }
 0x199   :  { %v256_v31 = vadd.f32 %v255_v29, %v1857_v25  ;;  %v305_v32 = vadd.f32 %v304_v30, %v1859_v26 }
 0x19b   :  { %v338_v34 = vmax.f32 %v256_v31, 0.0  ;;  %v339_v35 = vmax.f32 %v305_v32, 0.0 }
 0x19d   :  { %v357_v36 = vpack.c.bf16 %v339_v35, %v338_v34 }
 0x19f   :  { %v409_v38 = vunpack.c.l.b16 %v357_v36  ;;  %v558_v40 = vunpack.c.h.b16 %v357_v36 }
 0x1a0   :  { %v258_v41 = vpop.f32.mrf.mxu0  ;;  %v307_v42 = vpop.f32.mrf.mxu1 }
 0x1a1   :  { %v418_v43 = vpack.c.b16 %v409_v38, %v408_v37  ;;  %v567_v44 = vpack.c.b16 %v558_v40, %v557_v39  ;;  %v259_v45 = vadd.f32 %v258_v41, %v1857_v25  ;;  %v308_v46 = vadd.f32 %v307_v42, %v1859_v26 }
 0x1a3   :  { %514 = vmatmul.bf16.gmra.mxu2 %v418_v43  ;;  %663 = vmatmul.bf16.gmra.mxu3 %v567_v44  ;;  %v340_v47 = vmax.f32 %v259_v45, 0.0  ;;  %v341_v48 = vmax.f32 %v308_v46, 0.0 }
 0x1a5   :  { %v358_v53 = vpack.c.bf16 %v341_v48, %v340_v47 }
 0x1a7   :  { %v410_v57 = vunpack.c.l.b16 %v358_v53  ;;  %v559_v59 = vunpack.c.h.b16 %v358_v53 }
 0x1a8   :  { %v260_v49 = vpop.f32.mrf.mxu0  ;;  %v309_v50 = vpop.f32.mrf.mxu1 }
 0x1a9   :  { %v261_v51 = vadd.f32 %v260_v49, %v1857_v25  ;;  %v310_v52 = vadd.f32 %v309_v50, %v1859_v26 }
 0x1ab   :  { %v342_v54 = vmax.f32 %v261_v51, 0.0  ;;  %v343_v55 = vmax.f32 %v310_v52, 0.0 }
 0x1ad   :  { %v359_v56 = vpack.c.bf16 %v343_v55, %v342_v54 }
 0x1af   :  { %v411_v58 = vunpack.c.l.b16 %v359_v56  ;;  %v560_v60 = vunpack.c.h.b16 %v359_v56 }
 0x1b1   :  { %v419_v61 = vpack.c.b16 %v411_v58, %v410_v57  ;;  %v568_v62 = vpack.c.b16 %v560_v60, %v559_v59 }
 0x1b3   :  { %519 = vmatmul.bf16.gmra.mxu2 %v419_v61  ;;  %668 = vmatmul.bf16.gmra.mxu3 %v568_v62 }
 0x1c6   :  { %v485_v25 = vpop.f32.mrf.mxu2  ;;  %v634_v0 = vpop.f32.mrf.mxu3 }
 0x1c7   :  { %v635_v26 = vadd.f32 %v1896_v63, %v634_v0  ;;  %v486_v43 = vadd.f32 %v1908_v19, %v485_v25 }
 0x1c9   :  { %690 = vxpose.xlu2.b32.start [1/8] (short) (narrow) %v635_v26, 16  ;;  %v674_v50 = vpack.c.bf16 %v486_v43, %v486_v43 }
 0x1cb   :  { %v1149_v56 = vunpack.c.l.b16 %v674_v50 }
 0x1ce   :  { %v487_v1 = vpop.f32.mrf.mxu2  ;;  %v636_v2 = vpop.f32.mrf.mxu3 }
 0x1cf   :  { %v637_v3 = vadd.f32 %v1896_v63, %v636_v2  ;;  %v488_v37 = vadd.f32 %v1908_v19, %v487_v1 }
 0x1d1   :  { %691 = vxpose.xlu2.b32.cont [2/8] (short) (narrow) %v637_v3, 16  ;;  %v675_v47 = vpack.c.bf16 %v488_v37, %v488_v37 }
 0x1d3   :  { %v1150_v52 = vunpack.c.l.b16 %v675_v47 }
 0x1d5   :  { %v1157_v58 = vpack.c.b16 %v1150_v52, %v1149_v56 }
 0x1d6   :  { %v490_v4 = vpop.f32.mrf.mxu2  ;;  %v639_v5 = vpop.f32.mrf.mxu3 }
 0x1d7   :  { %v640_v6 = vadd.f32 %v1896_v63, %v639_v5  ;;  %v491_v33 = vadd.f32 %v1908_v19, %v490_v4 }
 0x1d9   :  { %692 = vxpose.xlu2.b32.cont [3/8] (short) (narrow) %v640_v6, 16  ;;  %v676_v44 = vpack.c.bf16 %v491_v33, %v491_v33 }
 0x1db   :  { %v1151_v51 = vunpack.c.l.b16 %v676_v44 }
 0x1de   :  { %v492_v7 = vpop.f32.mrf.mxu2  ;;  %v641_v8 = vpop.f32.mrf.mxu3 }
 0x1df   :  { %v642_v9 = vadd.f32 %v1896_v63, %v641_v8  ;;  %v493_v30 = vadd.f32 %v1908_v19, %v492_v7 }
 0x1e1   :  { %693 = vxpose.xlu2.b32.cont [4/8] (short) (narrow) %v642_v9, 16  ;;  %v677_v38 = vpack.c.bf16 %v493_v30, %v493_v30 }
 0x1e3   :  { %v1152_v48 = vunpack.c.l.b16 %v677_v38 }
 0x1e5   :  { %v1158_v53 = vpack.c.b16 %v1152_v48, %v1151_v51 }
 0x1e6   :  { %v495_v10 = vpop.f32.mrf.mxu2  ;;  %v644_v11 = vpop.f32.mrf.mxu3 }
 0x1e7   :  { %v645_v12 = vadd.f32 %v1896_v63, %v644_v11  ;;  %v496_v24 = vadd.f32 %v1908_v19, %v495_v10 }
 0x1e9   :  { %694 = vxpose.xlu2.b32.cont [5/8] (short) (narrow) %v645_v12, 16  ;;  %v678_v34 = vpack.c.bf16 %v496_v24, %v496_v24 }
 0x1eb   :  { %v1153_v45 = vunpack.c.l.b16 %v678_v34 }
 0x1ee   :  { %v497_v13 = vpop.f32.mrf.mxu2  ;;  %v646_v14 = vpop.f32.mrf.mxu3 }
 0x1ef   :  { %v647_v15 = vadd.f32 %v1896_v63, %v646_v14  ;;  %v498_v21 = vadd.f32 %v1908_v19, %v497_v13 }
 0x1f1   :  { %695 = vxpose.xlu2.b32.cont [6/8] (short) (narrow) %v647_v15, 16  ;;  %v679_v31 = vpack.c.bf16 %v498_v21, %v498_v21 }
 0x1f3   :  { %v1154_v39 = vunpack.c.l.b16 %v679_v31 }
 0x1f5   :  { %v1159_v49 = vpack.c.b16 %v1154_v39, %v1153_v45 }
 0x1f6   :  { %v500_v16 = vpop.f32.mrf.mxu2  ;;  %v649_v17 = vpop.f32.mrf.mxu3 }
 0x1f7   :  { %v650_v18 = vadd.f32 %v1896_v63, %v649_v17  ;;  %v501_v20 = vadd.f32 %v1908_v19, %v500_v16 }
 0x1f9   :  { %696 = vxpose.xlu2.b32.cont [7/8] (short) (narrow) %v650_v18, 16  ;;  %v680_v27 = vpack.c.bf16 %v501_v20, %v501_v20 }
 0x1fb   :  { %v1155_v35 = vunpack.c.l.b16 %v680_v27 }
 0x1fe   :  { %v502_v22 = vpop.f32.mrf.mxu2  ;;  %v651_v23 = vpop.f32.mrf.mxu3 }
 0x1ff   :  { %v503_v28 = vadd.f32 %v1908_v19, %v502_v22  ;;  %v652_v29 = vadd.f32 %v1896_v63, %v651_v23 }
 0x201   :  { %v681_v32 = vpack.c.bf16 %v503_v28, %v503_v28  ;;  %697 = vxpose.xlu2.b32.end [8/8] (short) (narrow) %v652_v29, 16 }
 0x203   :  { %v1156_v36 = vunpack.c.l.b16 %v681_v32 }
 0x205   :  { %v1160_v40 = vpack.c.b16 %v1156_v36, %v1155_v35 }
 0x206   :  { %v1918_v41 = vpop.f32.mrf.mxu2  ;;  %v654_v42 = vpop.f32.mrf.mxu3 }
 0x207   :  { %v655_v46 = vadd.f32 %v1896_v63, %v654_v42  ;;  %1172 = vmatpush.bf16.msrb.mxu0 %v1160_v40  ;;  %v506_v31 = vadd.f32 %v1908_v19, %v1918_v41 }
 0x209   :  { %722 = vxpose.xlu0.b32.start [1/8] (short) (narrow) %v655_v46, 16  ;;  %v682_v36 = vpack.c.bf16 %v506_v31, %v506_v31 }
 0x20b   :  { %1173 = vmatpush.bf16.msrb.mxu0 %v1159_v49  ;;  %v1195_v40 = vunpack.c.l.b16 %v682_v36 }
 0x20e   :  { %v507_v54 = vpop.f32.mrf.mxu2  ;;  %v656_v55 = vpop.f32.mrf.mxu3 }
 0x20f   :  { %v657_v57 = vadd.f32 %v1896_v63, %v656_v55  ;;  %1174 = vmatpush.bf16.msrb.mxu0 %v1158_v53  ;;  %v508_v27 = vadd.f32 %v1908_v19, %v507_v54 }
 0x211   :  { %723 = vxpose.xlu0.b32.cont [2/8] (short) (narrow) %v657_v57, 16  ;;  %v683_v33 = vpack.c.bf16 %v508_v27, %v508_v27 }
 0x213   :  { %1175 = vmatpush.bf16.msrb.mxu0 %v1157_v58  ;;  %v1196_v38 = vunpack.c.l.b16 %v683_v33 }
 0x215   :  { %v1203_v42 = vpack.c.b16 %v1196_v38, %v1195_v40 }
 0x216   :  { %v510_v59 = vpop.f32.mrf.mxu2  ;;  %v659_v60 = vpop.f32.mrf.mxu3 }
 0x217   :  { %v660_v61 = vadd.f32 %v1896_v63, %v659_v60  ;;  %v511_v21 = vadd.f32 %v1908_v19, %v510_v59 }
 0x219   :  { %724 = vxpose.xlu0.b32.cont [3/8] (short) (narrow) %v660_v61, 16  ;;  %v684_v32 = vpack.c.bf16 %v511_v21, %v511_v21 }
 0x21b   :  { %v1197_v37 = vunpack.c.l.b16 %v684_v32 }
 0x21e   :  { %v512_v62 = vpop.f32.mrf.mxu2  ;;  %v661_v25 = vpop.f32.mrf.mxu3 }
 0x21f   :  { %v662_v0 = vadd.f32 %v1896_v63, %v661_v25  ;;  %v513_v17 = vadd.f32 %v1908_v19, %v512_v62 }
 0x221   :  { %725 = vxpose.xlu0.b32.cont [4/8] (short) (narrow) %v662_v0, 16  ;;  %v685_v28 = vpack.c.bf16 %v513_v17, %v513_v17 }
 0x223   :  { %v1198_v34 = vunpack.c.l.b16 %v685_v28 }
 0x225   :  { %v1204_v39 = vpack.c.b16 %v1198_v34, %v1197_v37 }
 0x226   :  { %v515_v26 = vpop.f32.mrf.mxu2  ;;  %v664_v1 = vpop.f32.mrf.mxu3 }
 0x227   :  { %v665_v2 = vadd.f32 %v1896_v63, %v664_v1  ;;  %v516_v13 = vadd.f32 %v1908_v19, %v515_v26 }
 0x229   :  { %726 = vxpose.xlu0.b32.cont [5/8] (short) (narrow) %v665_v2, 16  ;;  %v686_v22 = vpack.c.bf16 %v516_v13, %v516_v13 }
 0x22e   :  { %v517_v3 = vpop.f32.mrf.mxu2  ;;  %v666_v4 = vpop.f32.mrf.mxu3 }
 0x22f   :  { %v667_v5 = vadd.f32 %v1896_v63, %v666_v4  ;;  %v518_v10 = vadd.f32 %v1908_v19, %v517_v3 }
 0x231   :  { %727 = vxpose.xlu0.b32.cont [6/8] (short) (narrow) %v667_v5, 16  ;;  %v687_v18 = vpack.c.bf16 %v518_v10, %v518_v10 }
 0x233   :  { %v1200_v29 = vunpack.c.l.b16 %v687_v18 }
 0x236   :  { %v520_v6 = vpop.f32.mrf.mxu2  ;;  %v669_v7 = vpop.f32.mrf.mxu3 }
 0x237   :  { %v670_v8 = vadd.f32 %v1896_v63, %v669_v7  ;;  %v521_v9 = vadd.f32 %v1908_v19, %v520_v6 }
 0x239   :  { %728 = vxpose.xlu0.b32.cont [7/8] (short) (narrow) %v670_v8, 16  ;;  %v688_v14 = vpack.c.bf16 %v521_v9, %v521_v9 }
 0x23b   :  { %v1201_v23 = vunpack.c.l.b16 %v688_v14 }
 0x23e   :  { %v522_v11 = vpop.f32.mrf.mxu2  ;;  %v671_v12 = vpop.f32.mrf.mxu3 }
 0x23f   :  { %v523_v15 = vadd.f32 %v1908_v19, %v522_v11  ;;  %v672_v16 = vadd.f32 %v1896_v63, %v671_v12  ;;  %v1199_v63 = vunpack.c.l.b16 %v686_v22 }
 0x241   :  { %v689_v20 = vpack.c.bf16 %v523_v15, %v523_v15  ;;  %729 = vxpose.xlu0.b32.end [8/8] (short) (narrow) %v672_v16, 16  ;;  %v1205_v35 = vpack.c.b16 %v1200_v29, %v1199_v63 }
 0x243   :  { %v1202_v24 = vunpack.c.l.b16 %v689_v20 }
 0x245   :  { %v1206_v30 = vpack.c.b16 %v1202_v24, %v1201_v23 }
 0x247   :  { %1218 = vmatpush.bf16.msrb.mxu1 %v1206_v30 }
 0x24b   :  { %1219 = vmatpush.bf16.msrb.mxu1 %v1205_v35 }
 0x24f   :  { %1220 = vmatpush.bf16.msrb.mxu1 %v1204_v39 }
 0x253   :  { %1221 = vmatpush.bf16.msrb.mxu1 %v1203_v42 }
 0x262   :  { %v1938_v43 = vpop.trf.xlu2 }
 0x263   :  { %v754_v19 = vsel %vm189_vm0, %v1938_v43, -inf }
 0x264   :  { %755 = vmax.xlane.f32.xlu1 %v754_v19 }
 0x26a   :  { %v1942_v41 = vpop.trf.xlu2 }
 0x26b   :  { %v757_v44 = vsel %vm189_vm0, %v1942_v41, -inf }
 0x272   :  { %758 = vmax.xlane.f32.xlu2 %v757_v44 }
 0x2ad   :  { %v1946_v45 = vpop.trf.xlu0 }
 0x2ae   :  { %v760_v46 = vsel %vm189_vm0, %v1946_v45, -inf }
 0x2b2   :  { %761 = vmax.xlane.f32.xlu0 %v760_v46 }
 0x2b5   :  { %v1950_v47 = vpop.trf.xlu0 }
 0x2b6   :  { %v763_v48 = vsel %vm189_vm0, %v1950_v47, -inf }
 0x2b7   :  { %764 = vmax.xlane.f32.xlu1 %v763_v48 }
 0x2d7   :  { %v756_v49 = vpop.xlane.xlu1 %755 }
 0x2d8   :  { %v766_v50 = vsub.f32 %v1938_v43, %v756_v49 }
 0x2da   :  { %v770_v51 = vmul.f32 1.442695, %v766_v50 }
 0x2dc   :  { %1569 = vpow2.f32 %v770_v51 }
 0x2e2   :  { %v1570_v52 = vpop.eup %1569 }
 0x2e3   :  { %v778_v53 = vsel %vm189_vm0, %v1570_v52, 0.0 }
 0x2e4   :  { %779 = vadd.xlane.f32.xlu1 %v778_v53 }
 0x2e5   :  { %v759_v54 = vpop.xlane.xlu2 %758 }
 0x2e6   :  { %v767_v55 = vsub.f32 %v1942_v41, %v759_v54 }
 0x2e8   :  { %v772_v56 = vmul.f32 1.442695, %v767_v55 }
 0x2ea   :  { %1571 = vpow2.f32 %v772_v56 }
 0x2f0   :  { %v1572_v57 = vpop.eup %1571 }
 0x2f1   :  { %v781_v58 = vsel %vm189_vm0, %v1572_v57, 0.0 }
 0x2f2   :  { %782 = vadd.xlane.f32.xlu1 %v781_v58 }
 0x325   :  { %v1958_v59 = vpop.xlane.xlu0 %761 }
 0x326   :  { %v768_v60 = vsub.f32 %v1946_v45, %v1958_v59 }
 0x328   :  { %v774_v61 = vmul.f32 1.442695, %v768_v60 }
 0x32a   :  { %1573 = vpow2.f32 %v774_v61  ;;  %v1962_v62 = vpop.xlane.xlu1 %764 }
 0x32b   :  { %v769_v25 = vsub.f32 %v1950_v47, %v1962_v62 }
 0x32d   :  { %v776_v0 = vmul.f32 1.442695, %v769_v25 }
 0x32f   :  { %1575 = vpow2.f32 %v776_v0 }
 0x330   :  { %v1574_v26 = vpop.eup %1573 }
 0x331   :  { %v784_v1 = vsel %vm189_vm0, %v1574_v26, 0.0 }
 0x332   :  { %785 = vadd.xlane.f32.xlu2 %v784_v1 }
 0x335   :  { %v1576_v2 = vpop.eup %1575 }
 0x336   :  { %v787_v3 = vsel %vm189_vm0, %v1576_v2, 0.0 }
 0x337   :  { %788 = vadd.xlane.f32.xlu1 %v787_v3 }
 0x357   :  { %v780_v4 = vpop.xlane.xlu1 %779 }
 0x358   :  { %1577 = vlog2.f32 %v780_v4 }
 0x35e   :  { %v1578_v5 = vpop.eup %1577 }
 0x35f   :  { %v791_v6 = vmul.f32 0.6931472, %v1578_v5 }
 0x361   :  { %v798_v8 = vadd.f32 %v791_v6, %v756_v49 }
 0x363   :  { %v802_v10 = vsub.f32 -4.158883, %v798_v8 }
 0x365   :  { %v783_v7 = vpop.xlane.xlu1 %782  ;;  %v806_v13 = vadd.f32 %v802_v10, %v1938_v43 }
 0x366   :  { %1579 = vlog2.f32 %v783_v7 }
 0x367   :  { %v810_v16 = vsel %vm189_vm0, %v806_v13, -inf }
 0x36c   :  { %v1580_v9 = vpop.eup %1579 }
 0x36d   :  { %v793_v11 = vmul.f32 0.6931472, %v1580_v9 }
 0x36f   :  { %v799_v12 = vadd.f32 %v793_v11, %v759_v54 }
 0x371   :  { %v803_v14 = vsub.f32 -4.158883, %v799_v12 }
 0x373   :  { %v807_v15 = vadd.f32 %v803_v14, %v1942_v41 }
 0x375   :  { %v811_v17 = vsel %vm189_vm0, %v807_v15, -inf }
 0x376   :  { %v812_v18 = vmax.f32 %v810_v16, %v811_v17 }
 0x378   :  { %v813_v20 = vrot.slane %v812_v18, 4 }
 0x37a   :  { %v814_v21 = vmax.f32 %v812_v18, %v813_v20 }
 0x37c   :  { %v815_v22 = vrot.slane %v814_v21, 2 }
 0x37e   :  { %v816_v23 = vmax.f32 %v814_v21, %v815_v22 }
 0x380   :  { %v817_v24 = vrot.slane %v816_v23, 1 }
 0x382   :  { %v818_v27 = vmax.f32 %v816_v23, %v817_v24 }
 0x384   :  { %v828_v28 = vsub.f32 %v806_v13, %v818_v27  ;;  %v829_v29 = vsub.f32 %v807_v15, %v818_v27 }
 0x386   :  { %v832_v30 = vmul.f32 1.442695, %v828_v28  ;;  %v834_v31 = vmul.f32 1.442695, %v829_v29 }
 0x388   :  { %1581 = vpow2.f32 %v832_v30 }
 0x389   :  { %1583 = vpow2.f32 %v834_v31 }
 0x38e   :  { %v1582_v32 = vpop.eup %1581 }
 0x38f   :  { %v1584_v63 = vpop.eup %1583  ;;  %v840_v33 = vsel %vm189_vm0, %v1582_v32, 0.0 }
 0x390   :  { %v841_v34 = vsel %vm189_vm0, %v1584_v63, 0.0 }
 0x391   :  { %v842_v35 = vadd.f32 %v841_v34, %v840_v33 }
 0x393   :  { %v843_v36 = vrot.slane %v842_v35, 4 }
 0x395   :  { %v844_v37 = vadd.f32 %v843_v36, %v842_v35 }
 0x397   :  { %v845_v38 = vrot.slane %v844_v37, 2 }
 0x399   :  { %v846_v39 = vadd.f32 %v845_v38, %v844_v37 }
 0x39b   :  { %v847_v40 = vrot.slane %v846_v39, 1 }
 0x39d   :  { %v848_v42 = vadd.f32 %v847_v40, %v846_v39 }
 0x39f   :  { %1585 = vlog2.f32 %v848_v42 }
 0x3a5   :  { %v1586_v19 = vpop.eup %1585  ;;  %v786_v44 = vpop.xlane.xlu2 %785 }
 0x3a6   :  { %1587 = vlog2.f32 %v786_v44  ;;  %v859_v46 = vmul.f32 0.6931472, %v1586_v19 }
 0x3a8   :  { %v862_v48 = vadd.f32 %v859_v46, %v818_v27 }
 0x3aa   :  { %v789_v49 = vpop.xlane.xlu1 %788  ;;  %v864_v50 = vsub.f32 -4.158883, %v862_v48 }
 0x3ab   :  { %1589 = vlog2.f32 %v789_v49 }
 0x3ac   :  { %v1588_v51 = vpop.eup %1587  ;;  %v867_v52 = vadd.f32 %v864_v50, %v1942_v41  ;;  %v866_v53 = vadd.f32 %v864_v50, %v1938_v43 }
 0x3ad   :  { %v795_v54 = vmul.f32 0.6931472, %v1588_v51 }
 0x3ae   :  { %v873_v55 = vsel %vm189_vm0, %v867_v52, -inf  ;;  %v870_v56 = vsel %vm189_vm0, %v866_v53, -inf }
 0x3af   :  { %v800_v57 = vadd.f32 %v795_v54, %v1958_v59  ;;  %874 = vmax.xlane.f32.xlu1 %v873_v55  ;;  %871 = vmax.xlane.f32.xlu2 %v870_v56 }
 0x3b1   :  { %v1590_v58 = vpop.eup %1589  ;;  %v804_v60 = vsub.f32 -4.158883, %v800_v57 }
 0x3b2   :  { %v797_v61 = vmul.f32 0.6931472, %v1590_v58 }
 0x3b3   :  { %v808_v0 = vadd.f32 %v804_v60, %v1946_v45 }
 0x3b4   :  { %v801_v25 = vadd.f32 %v797_v61, %v1962_v62 }
 0x3b5   :  { %v819_v2 = vsel %vm189_vm0, %v808_v0, -inf }
 0x3b6   :  { %v805_v26 = vsub.f32 -4.158883, %v801_v25 }
 0x3b8   :  { %v809_v1 = vadd.f32 %v805_v26, %v1950_v47 }
 0x3ba   :  { %v820_v3 = vsel %vm189_vm0, %v809_v1, -inf }
 0x3bb   :  { %v821_v4 = vmax.f32 %v819_v2, %v820_v3 }
 0x3bd   :  { %v822_v5 = vrot.slane %v821_v4, 4 }
 0x3bf   :  { %v823_v6 = vmax.f32 %v821_v4, %v822_v5 }
 0x3c1   :  { %v824_v59 = vrot.slane %v823_v6, 2 }
 0x3c3   :  { %v825_v7 = vmax.f32 %v823_v6, %v824_v59 }
 0x3c5   :  { %v826_v8 = vrot.slane %v825_v7, 1 }
 0x3c7   :  { %v827_v9 = vmax.f32 %v825_v7, %v826_v8 }
 0x3c9   :  { %v830_v10 = vsub.f32 %v808_v0, %v827_v9  ;;  %v831_v11 = vsub.f32 %v809_v1, %v827_v9 }
 0x3cb   :  { %v836_v12 = vmul.f32 1.442695, %v830_v10  ;;  %v838_v62 = vmul.f32 1.442695, %v831_v11 }
 0x3cd   :  { %1591 = vpow2.f32 %v836_v12 }
 0x3ce   :  { %1593 = vpow2.f32 %v838_v62 }
 0x3d3   :  { %v1592_v13 = vpop.eup %1591 }
 0x3d4   :  { %v1594_v14 = vpop.eup %1593  ;;  %v849_v15 = vsel %vm189_vm0, %v1592_v13, 0.0 }
 0x3d5   :  { %v850_v16 = vsel %vm189_vm0, %v1594_v14, 0.0 }
 0x3d6   :  { %v851_v17 = vadd.f32 %v850_v16, %v849_v15 }
 0x3d8   :  { %v852_v18 = vrot.slane %v851_v17, 4 }
 0x3da   :  { %v853_v20 = vadd.f32 %v852_v18, %v851_v17 }
 0x3dc   :  { %v854_v21 = vrot.slane %v853_v20, 2 }
 0x3de   :  { %v855_v22 = vadd.f32 %v854_v21, %v853_v20 }
 0x3e0   :  { %v856_v23 = vrot.slane %v855_v22, 1 }
 0x3e2   :  { %v857_v24 = vadd.f32 %v856_v23, %v855_v22 }
 0x3e4   :  { %1595 = vlog2.f32 %v857_v24 }
 0x3ea   :  { %v1596_v27 = vpop.eup %1595 }
 0x3eb   :  { %v861_v28 = vmul.f32 0.6931472, %v1596_v27 }
 0x3ed   :  { %v863_v29 = vadd.f32 %v861_v28, %v827_v9 }
 0x3ef   :  { %v865_v30 = vsub.f32 -4.158883, %v863_v29 }
 0x3f1   :  { %v869_v31 = vadd.f32 %v865_v30, %v1950_v47  ;;  %v868_v32 = vadd.f32 %v865_v30, %v1946_v45 }
 0x3f3   :  { %v879_v63 = vsel %vm189_vm0, %v869_v31, -inf  ;;  %v876_v33 = vsel %vm189_vm0, %v868_v32, -inf }
 0x3f4   :  { %880 = vmax.xlane.f32.xlu1 %v879_v63  ;;  %877 = vmax.xlane.f32.xlu2 %v876_v33 }
 0x422   :  { %v875_v34 = vpop.xlane.xlu1 %874  ;;  %v872_v35 = vpop.xlane.xlu2 %871 }
 0x423   :  { %v883_v36 = vsub.f32 %v867_v52, %v875_v34  ;;  %v882_v37 = vsub.f32 %v866_v53, %v872_v35 }
 0x425   :  { %v888_v38 = vmul.f32 1.442695, %v883_v36  ;;  %v886_v39 = vmul.f32 1.442695, %v882_v37 }
 0x427   :  { %1597 = vpow2.f32 %v888_v38 }
 0x428   :  { %1599 = vpow2.f32 %v886_v39 }
 0x42d   :  { %v1598_v40 = vpop.eup %1597 }
 0x42e   :  { %v1600_v42 = vpop.eup %1599  ;;  %v897_v19 = vsel %vm189_vm0, %v1598_v40, 0.0 }
 0x42f   :  { %898 = vadd.xlane.f32.xlu1 %v897_v19  ;;  %v894_v44 = vsel %vm189_vm0, %v1600_v42, 0.0 }
 0x430   :  { %895 = vadd.xlane.f32.xlu2 %v894_v44 }
 0x467   :  { %v1992_v46 = vpop.xlane.xlu1 %880  ;;  %v1994_v48 = vpop.xlane.xlu2 %877 }
 0x468   :  { %v885_v49 = vsub.f32 %v869_v31, %v1992_v46  ;;  %v884_v50 = vsub.f32 %v868_v32, %v1994_v48 }
 0x46a   :  { %v892_v51 = vmul.f32 1.442695, %v885_v49  ;;  %v890_v52 = vmul.f32 1.442695, %v884_v50 }
 0x46c   :  { %1601 = vpow2.f32 %v892_v51 }
 0x46d   :  { %1603 = vpow2.f32 %v890_v52 }
 0x472   :  { %v1602_v53 = vpop.eup %1601 }
 0x473   :  { %v1604_v54 = vpop.eup %1603  ;;  %v903_v55 = vsel %vm189_vm0, %v1602_v53, 0.0 }
 0x474   :  { %904 = vadd.xlane.f32.xlu1 %v903_v55  ;;  %v900_v56 = vsel %vm189_vm0, %v1604_v54, 0.0 }
 0x475   :  { %901 = vadd.xlane.f32.xlu2 %v900_v56 }
 0x4a2   :  { %v899_v57 = vpop.xlane.xlu1 %898 }
 0x4a3   :  { %1605 = vlog2.f32 %v899_v57  ;;  %v896_v58 = vpop.xlane.xlu2 %895 }
 0x4a4   :  { %1607 = vlog2.f32 %v896_v58 }
 0x4a9   :  { %v1606_v60 = vpop.eup %1605 }
 0x4aa   :  { %v1608_v61 = vpop.eup %1607  ;;  %v909_v25 = vmul.f32 0.6931472, %v1606_v60 }
 0x4ab   :  { %v907_v0 = vmul.f32 0.6931472, %v1608_v61 }
 0x4ac   :  { %v915_v26 = vadd.f32 %v909_v25, %v875_v34 }
 0x4ad   :  { %v914_v1 = vadd.f32 %v907_v0, %v872_v35 }
 0x4ae   :  { %v919_v2 = vsub.f32 -4.158883, %v915_v26 }
 0x4af   :  { %v918_v3 = vsub.f32 -4.158883, %v914_v1 }
 0x4b0   :  { %v923_v4 = vadd.f32 %v919_v2, %v1942_v41 }
 0x4b1   :  { %v922_v5 = vadd.f32 %v918_v3, %v1938_v43 }
 0x4b2   :  { %v927_v6 = vsel %vm189_vm0, %v923_v4, -inf }
 0x4b3   :  { %v926_v59 = vsel %vm189_vm0, %v922_v5, -inf }
 0x4b4   :  { %v928_v7 = vmax.f32 %v926_v59, %v927_v6 }
 0x4b6   :  { %v929_v8 = vrot.slane %v928_v7, 4 }
 0x4b8   :  { %v930_v9 = vmax.f32 %v928_v7, %v929_v8 }
 0x4ba   :  { %v931_v10 = vrot.slane %v930_v9, 2 }
 0x4bc   :  { %v932_v11 = vmax.f32 %v930_v9, %v931_v10 }
 0x4be   :  { %v933_v12 = vrot.slane %v932_v11, 1 }
 0x4c0   :  { %v934_v62 = vmax.f32 %v932_v11, %v933_v12 }
 0x4c2   :  { %v944_v13 = vsub.f32 %v922_v5, %v934_v62  ;;  %v945_v14 = vsub.f32 %v923_v4, %v934_v62 }
 0x4c4   :  { %v948_v15 = vmul.f32 1.442695, %v944_v13  ;;  %v950_v16 = vmul.f32 1.442695, %v945_v14 }
 0x4c6   :  { %1609 = vpow2.f32 %v948_v15 }
 0x4c7   :  { %1611 = vpow2.f32 %v950_v16 }
 0x4cc   :  { %v1610_v17 = vpop.eup %1609 }
 0x4cd   :  { %v1612_v18 = vpop.eup %1611  ;;  %v956_v20 = vsel %vm189_vm0, %v1610_v17, 0.0 }
 0x4ce   :  { %v957_v21 = vsel %vm189_vm0, %v1612_v18, 0.0 }
 0x4cf   :  { %v958_v22 = vadd.f32 %v957_v21, %v956_v20 }
 0x4d1   :  { %v959_v23 = vrot.slane %v958_v22, 4 }
 0x4d3   :  { %v960_v24 = vadd.f32 %v959_v23, %v958_v22 }
 0x4d5   :  { %v961_v27 = vrot.slane %v960_v24, 2 }
 0x4d7   :  { %v962_v28 = vadd.f32 %v961_v27, %v960_v24 }
 0x4d9   :  { %v963_v29 = vrot.slane %v962_v28, 1 }
 0x4db   :  { %v964_v30 = vadd.f32 %v963_v29, %v962_v28 }
 0x4dd   :  { %1613 = vlog2.f32 %v964_v30 }
 0x4e3   :  { %v1614_v31 = vpop.eup %1613 }
 0x4e4   :  { %v975_v32 = vmul.f32 0.6931472, %v1614_v31 }
 0x4e6   :  { %v978_v63 = vadd.f32 %v975_v32, %v934_v62 }
 0x4e7   :  { %v905_v33 = vpop.xlane.xlu1 %904 }
 0x4e8   :  { %1615 = vlog2.f32 %v905_v33  ;;  %v902_v34 = vpop.xlane.xlu2 %901  ;;  %v980_v35 = vsub.f32 -4.158883, %v978_v63 }
 0x4e9   :  { %1617 = vlog2.f32 %v902_v34 }
 0x4ea   :  { %v983_v36 = vadd.f32 %v980_v35, %v1942_v41  ;;  %v982_v37 = vadd.f32 %v980_v35, %v1938_v43 }
 0x4ec   :  { %v989_v38 = vsel %vm189_vm0, %v983_v36, -inf  ;;  %v986_v39 = vsel %vm189_vm0, %v982_v37, -inf }
 0x4ed   :  { %990 = vmax.xlane.f32.xlu1 %v989_v38  ;;  %987 = vmax.xlane.f32.xlu2 %v986_v39 }
 0x4ee   :  { %v1616_v40 = vpop.eup %1615 }
 0x4ef   :  { %v1618_v42 = vpop.eup %1617  ;;  %v913_v19 = vmul.f32 0.6931472, %v1616_v40 }
 0x4f0   :  { %v911_v44 = vmul.f32 0.6931472, %v1618_v42 }
 0x4f1   :  { %v917_v49 = vadd.f32 %v913_v19, %v1992_v46 }
 0x4f2   :  { %v916_v50 = vadd.f32 %v911_v44, %v1994_v48 }
 0x4f3   :  { %v921_v51 = vsub.f32 -4.158883, %v917_v49 }
 0x4f4   :  { %v920_v52 = vsub.f32 -4.158883, %v916_v50 }
 0x4f5   :  { %v925_v53 = vadd.f32 %v921_v51, %v1950_v47 }
 0x4f6   :  { %v924_v54 = vadd.f32 %v920_v52, %v1946_v45 }
 0x4f7   :  { %v936_v55 = vsel %vm189_vm0, %v925_v53, -inf }
 0x4f8   :  { %v935_v56 = vsel %vm189_vm0, %v924_v54, -inf }
 0x4f9   :  { %v937_v57 = vmax.f32 %v935_v56, %v936_v55 }
 0x4fb   :  { %v938_v58 = vrot.slane %v937_v57, 4 }
 0x4fd   :  { %v939_v60 = vmax.f32 %v937_v57, %v938_v58 }
 0x4ff   :  { %v940_v61 = vrot.slane %v939_v60, 2 }
 0x501   :  { %v941_v25 = vmax.f32 %v939_v60, %v940_v61 }
 0x503   :  { %v942_v0 = vrot.slane %v941_v25, 1 }
 0x505   :  { %v943_v26 = vmax.f32 %v941_v25, %v942_v0 }
 0x507   :  { %v946_v46 = vsub.f32 %v924_v54, %v943_v26  ;;  %v947_v1 = vsub.f32 %v925_v53, %v943_v26 }
 0x509   :  { %v952_v48 = vmul.f32 1.442695, %v946_v46  ;;  %v954_v2 = vmul.f32 1.442695, %v947_v1 }
 0x50b   :  { %1619 = vpow2.f32 %v952_v48 }
 0x50c   :  { %1621 = vpow2.f32 %v954_v2 }
 0x511   :  { %v1620_v3 = vpop.eup %1619 }
 0x512   :  { %v1622_v4 = vpop.eup %1621  ;;  %v965_v5 = vsel %vm189_vm0, %v1620_v3, 0.0 }
 0x513   :  { %v966_v6 = vsel %vm189_vm0, %v1622_v4, 0.0 }
 0x514   :  { %v967_v59 = vadd.f32 %v966_v6, %v965_v5 }
 0x516   :  { %v968_v7 = vrot.slane %v967_v59, 4 }
 0x518   :  { %v969_v8 = vadd.f32 %v968_v7, %v967_v59 }
 0x51a   :  { %v970_v9 = vrot.slane %v969_v8, 2 }
 0x51c   :  { %v971_v10 = vadd.f32 %v970_v9, %v969_v8 }
 0x51e   :  { %v972_v11 = vrot.slane %v971_v10, 1 }
 0x520   :  { %v973_v12 = vadd.f32 %v972_v11, %v971_v10 }
 0x522   :  { %1623 = vlog2.f32 %v973_v12 }
 0x528   :  { %v1624_v62 = vpop.eup %1623 }
 0x529   :  { %v977_v13 = vmul.f32 0.6931472, %v1624_v62 }
 0x52b   :  { %v979_v14 = vadd.f32 %v977_v13, %v943_v26 }
 0x52d   :  { %v981_v15 = vsub.f32 -4.158883, %v979_v14 }
 0x52f   :  { %v985_v16 = vadd.f32 %v981_v15, %v1950_v47  ;;  %v984_v17 = vadd.f32 %v981_v15, %v1946_v45 }
 0x531   :  { %v995_v18 = vsel %vm189_vm0, %v985_v16, -inf  ;;  %v992_v20 = vsel %vm189_vm0, %v984_v17, -inf }
 0x532   :  { %996 = vmax.xlane.f32.xlu1 %v995_v18  ;;  %993 = vmax.xlane.f32.xlu2 %v992_v20 }
 0x560   :  { %v991_v21 = vpop.xlane.xlu1 %990  ;;  %v988_v22 = vpop.xlane.xlu2 %987 }
 0x561   :  { %v999_v23 = vsub.f32 %v983_v36, %v991_v21  ;;  %v998_v24 = vsub.f32 %v982_v37, %v988_v22 }
 0x563   :  { %v1004_v27 = vmul.f32 1.442695, %v999_v23  ;;  %v1002_v28 = vmul.f32 1.442695, %v998_v24  ;;  %v2041_v23 = vstv %s2139_s7 }
 0x565   :  { %1625 = vpow2.f32 %v1004_v27 }
 0x566   :  { %1627 = vpow2.f32 %v1002_v28 }
 0x56b   :  { %v1626_v29 = vpop.eup %1625 }
 0x56c   :  { %v1628_v30 = vpop.eup %1627  ;;  %v1013_v31 = vsel %vm189_vm0, %v1626_v29, 0.0 }
 0x56d   :  { %1014 = vadd.xlane.f32.xlu1 %v1013_v31  ;;  %v1010_v32 = vsel %vm189_vm0, %v1628_v30, 0.0 }
 0x56e   :  { %1011 = vadd.xlane.f32.xlu2 %v1010_v32 }
 0x5a5   :  { %v2024_v63 = vpop.xlane.xlu1 %996  ;;  %v2026_v33 = vpop.xlane.xlu2 %993 }
 0x5a6   :  { %v1001_v34 = vsub.f32 %v985_v16, %v2024_v63  ;;  %v1000_v35 = vsub.f32 %v984_v17, %v2026_v33 }
 0x5a8   :  { %v1008_v36 = vmul.f32 1.442695, %v1001_v34  ;;  %v1006_v37 = vmul.f32 1.442695, %v1000_v35 }
 0x5aa   :  { %1629 = vpow2.f32 %v1008_v36 }
 0x5ab   :  { %1631 = vpow2.f32 %v1006_v37 }
 0x5b0   :  { %v1630_v38 = vpop.eup %1629 }
 0x5b1   :  { %v1632_v39 = vpop.eup %1631  ;;  %v1019_v40 = vsel %vm189_vm0, %v1630_v38, 0.0 }
 0x5b2   :  { %1020 = vadd.xlane.f32.xlu2 %v1019_v40  ;;  %v1016_v42 = vsel %vm189_vm0, %v1632_v39, 0.0 }
 0x5b3   :  { %1017 = vadd.xlane.f32.xlu0 %v1016_v42 }
 0x5e0   :  { %v1015_v19 = vpop.xlane.xlu1 %1014 }
 0x5e1   :  { %1633 = vlog2.f32 %v1015_v19  ;;  %v1012_v44 = vpop.xlane.xlu2 %1011 }
 0x5e2   :  { %1635 = vlog2.f32 %v1012_v44 }
 0x5e7   :  { %v1634_v49 = vpop.eup %1633 }
 0x5e8   :  { %v1636_v50 = vpop.eup %1635  ;;  %v1025_v51 = vmul.f32 0.6931472, %v1634_v49 }
 0x5e9   :  { %v1023_v52 = vmul.f32 0.6931472, %v1636_v50 }
 0x5ea   :  { %v1031_v53 = vadd.f32 %v1025_v51, %v991_v21 }
 0x5eb   :  { %v1030_v54 = vadd.f32 %v1023_v52, %v988_v22 }
 0x5ec   :  { %v1035_v55 = vsub.f32 -4.158883, %v1031_v53 }
 0x5ed   :  { %v1034_v56 = vsub.f32 -4.158883, %v1030_v54 }
 0x5ee   :  { %v1039_v57 = vadd.f32 %v1035_v55, %v1942_v41 }
 0x5ef   :  { %v1038_v58 = vadd.f32 %v1034_v56, %v1938_v43 }
 0x5f0   :  { %v1043_v60 = vsel %vm189_vm0, %v1039_v57, -inf }
 0x5f1   :  { %v1042_v61 = vsel %vm189_vm0, %v1038_v58, -inf }
 0x5f2   :  { %v1044_v25 = vmax.f32 %v1042_v61, %v1043_v60 }
 0x5f4   :  { %v1045_v0 = vrot.slane %v1044_v25, 4 }
 0x5f6   :  { %v1046_v26 = vmax.f32 %v1044_v25, %v1045_v0 }
 0x5f8   :  { %v1047_v46 = vrot.slane %v1046_v26, 2 }
 0x5fa   :  { %v1048_v1 = vmax.f32 %v1046_v26, %v1047_v46 }
 0x5fc   :  { %v1049_v48 = vrot.slane %v1048_v1, 1 }
 0x5fe   :  { %v1050_v2 = vmax.f32 %v1048_v1, %v1049_v48 }
 0x600   :  { %v1060_v3 = vsub.f32 %v1038_v58, %v1050_v2  ;;  %v1061_v4 = vsub.f32 %v1039_v57, %v1050_v2 }
 0x602   :  { %v1064_v5 = vmul.f32 1.442695, %v1060_v3  ;;  %v1066_v6 = vmul.f32 1.442695, %v1061_v4 }
 0x604   :  { %1637 = vpow2.f32 %v1064_v5 }
 0x605   :  { %1639 = vpow2.f32 %v1066_v6 }
 0x60a   :  { %v1638_v41 = vpop.eup %1637 }
 0x60b   :  { %v1640_v59 = vpop.eup %1639  ;;  %v1072_v43 = vsel %vm189_vm0, %v1638_v41, 0.0 }
 0x60c   :  { %v1073_v7 = vsel %vm189_vm0, %v1640_v59, 0.0 }
 0x60d   :  { %v1074_v8 = vadd.f32 %v1073_v7, %v1072_v43 }
 0x60f   :  { %v1075_v9 = vrot.slane %v1074_v8, 4 }
 0x611   :  { %v1076_v10 = vadd.f32 %v1075_v9, %v1074_v8 }
 0x613   :  { %v1077_v11 = vrot.slane %v1076_v10, 2 }
 0x615   :  { %v1078_v12 = vadd.f32 %v1077_v11, %v1076_v10 }
 0x617   :  { %v1079_v62 = vrot.slane %v1078_v12, 1 }
 0x619   :  { %v1080_v13 = vadd.f32 %v1079_v62, %v1078_v12 }
 0x61b   :  { %1641 = vlog2.f32 %v1080_v13 }
 0x621   :  { %v1642_v14 = vpop.eup %1641 }
 0x622   :  { %v1091_v15 = vmul.f32 0.6931472, %v1642_v14 }
 0x624   :  { %v1094_v16 = vadd.f32 %v1091_v15, %v1050_v2 }
 0x625   :  { %v1021_v17 = vpop.xlane.xlu2 %1020 }
 0x626   :  { %v1096_v18 = vsub.f32 -4.158883, %v1094_v16  ;;  %v1018_v20 = vpop.xlane.xlu0 %1017  ;;  %1643 = vlog2.f32 %v1021_v17 }
 0x627   :  { %1645 = vlog2.f32 %v1018_v20 }
 0x628   :  { %v1098_v21 = vadd.f32 %v1096_v18, %v1038_v58  ;;  %v1099_v22 = vadd.f32 %v1096_v18, %v1039_v57 }
 0x62a   :  { %v1497_v24 = vadd.f32 4.158883, %v1098_v21  ;;  %v1498_v27 = vadd.f32 4.158883, %v1099_v22 }
 0x62c   :  { %v1644_v28 = vpop.eup %1643  ;;  %v1108_v29 = vmul.f32 %v1497_v24, %v2041_v23  ;;  %v1109_v30 = vmul.f32 %v1498_v27, %v2041_v23  ;;  %v1120_v31 = vmul.f32 1.442695, %v1497_v24  ;;  %v1122_v32 = vmul.f32 1.442695, %v1498_v27 }
 0x62d   :  { %v1646_v34 = vpop.eup %1645  ;;  %v1029_v35 = vmul.f32 0.6931472, %v1644_v28 }
 0x62e   :  { %v1112_v36 = vmul.f32 1.442695, %v1108_v29  ;;  %1647 = vpow2.f32 %v1120_v31  ;;  %v1027_v37 = vmul.f32 0.6931472, %v1646_v34  ;;  %v1114_v38 = vmul.f32 1.442695, %v1109_v30 }
 0x62f   :  { %v1033_v39 = vadd.f32 %v1029_v35, %v2024_v63  ;;  %1649 = vpow2.f32 %v1122_v32 }
 0x630   :  { %1651 = vpow2.f32 %v1112_v36  ;;  %v1032_v40 = vadd.f32 %v1027_v37, %v2026_v33 }
 0x631   :  { %v1037_v42 = vsub.f32 -4.158883, %v1033_v39  ;;  %1653 = vpow2.f32 %v1114_v38 }
 0x632   :  { %v1036_v19 = vsub.f32 -4.158883, %v1032_v40 }
 0x633   :  { %v1041_v44 = vadd.f32 %v1037_v42, %v1950_v47 }
 0x634   :  { %v1648_v49 = vpop.eup %1647  ;;  %v1040_v50 = vadd.f32 %v1036_v19, %v1946_v45 }
 0x635   :  { %v1650_v51 = vpop.eup %1649  ;;  %v1052_v52 = vsel %vm189_vm0, %v1041_v44, -inf }
 0x636   :  { %v1652_v53 = vpop.eup %1651  ;;  %v1051_v54 = vsel %vm189_vm0, %v1040_v50, -inf }
 0x637   :  { %v1654_v55 = vpop.eup %1653  ;;  %v1053_v63 = vmax.f32 %v1051_v54, %v1052_v52  ;;  %v1128_v56 = vadd.f32 %v1652_v53, %v1648_v49 }
 0x638   :  { %v1129_v57 = vadd.f32 %v1654_v55, %v1650_v51 }
 0x639   :  { %v1054_v58 = vrot.slane %v1053_v63, 4  ;;  %v1132_v33 = vpack.c.bf16 %v1128_v56, %v1128_v56 }
 0x63a   :  { %v1133_v60 = vpack.c.bf16 %v1129_v57, %v1129_v57 }
 0x63b   :  { %v1055_v61 = vmax.f32 %v1053_v63, %v1054_v58  ;;  %v1138_v25 = vunpack.c.l.b16 %v1132_v33 }
 0x63c   :  { %v1139_v0 = vunpack.c.l.b16 %v1133_v60 }
 0x63d   :  { %v1056_v47 = vrot.slane %v1055_v61, 2 }
 0x63e   :  { %v1140_v26 = vpack.c.b16 %v1139_v0, %v1138_v25 }
 0x63f   :  { %v1057_v46 = vmax.f32 %v1055_v61, %v1056_v47 }
 0x640   :  { %1501 = vmatmul.msk.bf16.vlgmr.msrb.gmra.mxu0 %vm189_vm0, %v1140_v26 }
 0x641   :  { %v1058_v45 = vrot.slane %v1057_v46, 1 }
 0x643   :  { %v1059_v1 = vmax.f32 %v1057_v46, %v1058_v45 }
 0x645   :  { %v1062_v48 = vsub.f32 %v1040_v50, %v1059_v1  ;;  %v1063_v2 = vsub.f32 %v1041_v44, %v1059_v1 }
 0x647   :  { %v1068_v3 = vmul.f32 1.442695, %v1062_v48  ;;  %v1070_v4 = vmul.f32 1.442695, %v1063_v2 }
 0x649   :  { %1655 = vpow2.f32 %v1068_v3 }
 0x64a   :  { %1657 = vpow2.f32 %v1070_v4 }
 0x64f   :  { %v1656_v5 = vpop.eup %1655 }
 0x650   :  { %v1658_v6 = vpop.eup %1657  ;;  %v1081_v41 = vsel %vm189_vm0, %v1656_v5, 0.0 }
 0x651   :  { %v1082_v59 = vsel %vm189_vm0, %v1658_v6, 0.0 }
 0x652   :  { %v1083_v43 = vadd.f32 %v1082_v59, %v1081_v41 }
 0x654   :  { %v1084_v7 = vrot.slane %v1083_v43, 4 }
 0x656   :  { %v1085_v8 = vadd.f32 %v1084_v7, %v1083_v43 }
 0x658   :  { %v1086_v9 = vrot.slane %v1085_v8, 2 }
 0x65a   :  { %v1087_v10 = vadd.f32 %v1086_v9, %v1085_v8 }
 0x65c   :  { %v1088_v11 = vrot.slane %v1087_v10, 1 }
 0x65e   :  { %v1089_v12 = vadd.f32 %v1088_v11, %v1087_v10 }
 0x660   :  { %1659 = vlog2.f32 %v1089_v12 }
 0x666   :  { %v1660_v62 = vpop.eup %1659 }
 0x667   :  { %v1093_v13 = vmul.f32 0.6931472, %v1660_v62 }
 0x669   :  { %v1095_v14 = vadd.f32 %v1093_v13, %v1059_v1 }
 0x66b   :  { %v1097_v15 = vsub.f32 -4.158883, %v1095_v14 }
 0x66d   :  { %v1100_v16 = vadd.f32 %v1097_v15, %v1040_v50  ;;  %v1101_v17 = vadd.f32 %v1097_v15, %v1041_v44 }
 0x66f   :  { %v1499_v18 = vadd.f32 4.158883, %v1100_v16  ;;  %v1500_v20 = vadd.f32 4.158883, %v1101_v17 }
 0x671   :  { %v1110_v21 = vmul.f32 %v1499_v18, %v2041_v23  ;;  %v1111_v22 = vmul.f32 %v1500_v20, %v2041_v23  ;;  %v1124_v24 = vmul.f32 1.442695, %v1499_v18  ;;  %v1126_v27 = vmul.f32 1.442695, %v1500_v20 }
 0x673   :  { %v1118_v28 = vmul.f32 1.442695, %v1111_v22  ;;  %1661 = vpow2.f32 %v1126_v27  ;;  %v1116_v29 = vmul.f32 1.442695, %v1110_v21 }
 0x674   :  { %1663 = vpow2.f32 %v1124_v24 }
 0x675   :  { %1665 = vpow2.f32 %v1118_v28 }
 0x676   :  { %1667 = vpow2.f32 %v1116_v29 }
 0x679   :  { %v1662_v30 = vpop.eup %1661 }
 0x67a   :  { %v1664_v31 = vpop.eup %1663 }
 0x67b   :  { %v1666_v32 = vpop.eup %1665 }
 0x67c   :  { %v1668_v34 = vpop.eup %1667  ;;  %v1131_v35 = vadd.f32 %v1666_v32, %v1662_v30 }
 0x67d   :  { %v1130_v36 = vadd.f32 %v1668_v34, %v1664_v31 }
 0x67e   :  { %v1135_v37 = vpack.c.bf16 %v1131_v35, %v1131_v35 }
 0x67f   :  { %v1134_v38 = vpack.c.bf16 %v1130_v36, %v1130_v36 }
 0x680   :  { %v1185_v39 = vunpack.c.l.b16 %v1135_v37 }
 0x681   :  { %v1184_v40 = vunpack.c.l.b16 %v1134_v38 }
 0x683   :  { %v1186_v42 = vpack.c.b16 %v1185_v39, %v1184_v40 }
 0x685   :  { %1502 = vmatmul.msk.bf16.vlgmr.msrb.gmra.mxu1 %vm189_vm0, %v1186_v42 }
 0x6bd   :  { %v1177_v23 = vpop.f32.mrf.mxu0 }
 0x6be   :  { %1228 = vxpose.xlu1.b32.start [1/2] (short) (narrow) %v1177_v23, 32 }
 0x6c5   :  { %v1179_v19 = vpop.f32.mrf.mxu0 }
 0x6c6   :  { %1229 = vxpose.xlu1.b32.end [2/2] (short) (narrow) %v1179_v19, 32 }
 0x702   :  { %v1223_v44 = vpop.f32.mrf.mxu1 }
 0x703   :  { %1260 = vxpose.xlu0.b32.start [1/2] (short) (narrow) %v1223_v44, 32 }
 0x70a   :  { %v1225_v49 = vpop.f32.mrf.mxu1 }
 0x70b   :  { %1261 = vxpose.xlu0.b32.end [2/2] (short) (narrow) %v1225_v49, 32 }
 0x762   :  { %v2057_v50 = vpop.trf.xlu1 }
 0x763   :  { %v1292_v51 = vmul.f32 %v2057_v50, %v2057_v50 }
 0x765   :  { %v1301_v52 = vsel %vm1300_vm1, %v1292_v51, 0.0 }
 0x766   :  { %1302 = vadd.xlane.f32.xlu2 %v1301_v52 }
 0x76a   :  { %v2062_v53 = vpop.trf.xlu1 }
 0x76b   :  { %v1293_v54 = vmul.f32 %v2062_v53, %v2062_v53 }
 0x76d   :  { %v1304_v55 = vsel %vm1300_vm1, %v1293_v54, 0.0 }
 0x76e   :  { %1305 = vadd.xlane.f32.xlu2 %v1304_v55 }
 0x772   :  { %v2067_v63 = vpop.trf.xlu1 }
 0x773   :  { %v1294_v56 = vmul.f32 %v2067_v63, %v2067_v63 }
 0x775   :  { %v1307_v57 = vsel %vm1300_vm1, %v1294_v56, 0.0 }
 0x776   :  { %1308 = vadd.xlane.f32.xlu2 %v1307_v57 }
 0x77a   :  { %v2086_v46 = vpop.trf.xlu1 }
 0x77b   :  { %v1295_v1 = vmul.f32 %v2086_v46, %v2086_v46 }
 0x77d   :  { %v1310_v3 = vsel %vm1300_vm1, %v1295_v1, 0.0 }
 0x7a7   :  { %v2072_v58 = vpop.trf.xlu0 }
 0x7a8   :  { %v1296_v33 = vmul.f32 %v2072_v58, %v2072_v58 }
 0x7aa   :  { %v1313_v60 = vsel %vm1300_vm1, %v1296_v33, 0.0 }
 0x7ab   :  { %1314 = vadd.xlane.f32.xlu2 %v1313_v60 }
 0x7af   :  { %v2077_v61 = vpop.trf.xlu0 }
 0x7b0   :  { %v1297_v25 = vmul.f32 %v2077_v61, %v2077_v61 }
 0x7b2   :  { %v1316_v0 = vsel %vm1300_vm1, %v1297_v25, 0.0 }
 0x7b3   :  { %1317 = vadd.xlane.f32.xlu2 %v1316_v0 }
 0x7b7   :  { %v2082_v47 = vpop.trf.xlu0 }
 0x7b8   :  { %v1298_v26 = vmul.f32 %v2082_v47, %v2082_v47 }
 0x7ba   :  { %v1319_v45 = vsel %vm1300_vm1, %v1298_v26, 0.0 }
 0x7bb   :  { %1320 = vadd.xlane.f32.xlu2 %v1319_v45 }
 0x7bf   :  { %v1279_v48 = vpop.trf.xlu0 }
 0x7c0   :  { %v1299_v2 = vmul.f32 %v1279_v48, %v1279_v48 }
 0x7c2   :  { %v1322_v4 = vsel %vm1300_vm1, %v1299_v2, 0.0 }
 0x7c3   :  { %1323 = vadd.xlane.f32.xlu0 %v1322_v4  ;;  %1311 = vadd.xlane.f32.xlu2 %v1310_v3 }
 0x7d9   :  { %v1303_v5 = vpop.xlane.xlu2 %1302 }
 0x7e1   :  { %v1306_v6 = vpop.xlane.xlu2 %1305 }
 0x7e2   :  { %v1325_v8 = vadd.f32 %v1306_v6, %v1303_v5 }
 0x7e9   :  { %v1309_v41 = vpop.xlane.xlu2 %1308 }
 0x7ea   :  { %v1326_v10 = vadd.f32 %v1325_v8, %v1309_v41 }
 0x81e   :  { %v1315_v59 = vpop.xlane.xlu2 %1314 }
 0x826   :  { %v1318_v43 = vpop.xlane.xlu2 %1317 }
 0x827   :  { %v1334_v9 = vadd.f32 %v1318_v43, %v1315_v59 }
 0x82e   :  { %v1321_v7 = vpop.xlane.xlu2 %1320 }
 0x82f   :  { %v1335_v11 = vadd.f32 %v1334_v9, %v1321_v7 }
 0x836   :  { %v1324_v12 = vpop.xlane.xlu0 %1323  ;;  %v1312_v62 = vpop.xlane.xlu2 %1311 }
 0x837   :  { %v1336_v13 = vadd.f32 %v1335_v11, %v1324_v12  ;;  %v1327_v14 = vadd.f32 %v1326_v10, %v1312_v62 }
 0x839   :  { %v1337_v15 = vrot.slane %v1336_v13, 4  ;;  %v1328_v16 = vrot.slane %v1327_v14, 4 }
 0x83b   :  { %v1338_v17 = vadd.f32 %v1337_v15, %v1336_v13  ;;  %v1329_v18 = vadd.f32 %v1328_v16, %v1327_v14 }
 0x83d   :  { %v1339_v20 = vrot.slane %v1338_v17, 2  ;;  %v1330_v21 = vrot.slane %v1329_v18, 2 }
 0x83f   :  { %v1340_v22 = vadd.f32 %v1339_v20, %v1338_v17  ;;  %v1331_v24 = vadd.f32 %v1330_v21, %v1329_v18 }
 0x841   :  { %v1341_v27 = vrot.slane %v1340_v22, 1  ;;  %v1332_v28 = vrot.slane %v1331_v24, 1 }
 0x843   :  { %v1342_v29 = vadd.f32 %v1341_v27, %v1340_v22  ;;  %v1333_v30 = vadd.f32 %v1332_v28, %v1331_v24 }
 0x845   :  { %v1344_v31 = vmax.f32 %v1342_v29, 1e-24  ;;  %v1343_v32 = vmax.f32 %v1333_v30, 1e-24 }
 0x847   :  { %1669 = vrsqrt.f32 %v1344_v31  ;;  %vm1361_vm3 = vweird.f32 %v1344_v31  ;;  %vm1351_vm6 = vweird.f32 %v1343_v32 }
 0x848   :  { %1671 = vrsqrt.f32 %v1343_v32 }
 0x84d   :  { %v1670_v34 = vpop.eup %1669 }
 0x84e   :  { %v1672_v35 = vpop.eup %1671  ;;  %v1356_v36 = vmul.f32 %v1670_v34, %v1344_v31  ;;  %vm1362_vm2 = vweird.f32 %v1670_v34 }
 0x84f   :  { %v1346_v37 = vmul.f32 %v1672_v35, %v1343_v32  ;;  %vm1352_vm4 = vweird.f32 %v1672_v35  ;;  %vm1363_vm5 = vmor %vm1361_vm3, %vm1362_vm2 }
 0x850   :  { %v1357_v38 = vmul.f32 %v1670_v34, %v1356_v36  ;;  %vm1353_vm7 = vmor %vm1351_vm6, %vm1352_vm4 }
 0x851   :  { %v1347_v39 = vmul.f32 %v1672_v35, %v1346_v37 }
 0x852   :  { %v1358_v40 = vmul.f32 0.5, %v1357_v38 }
 0x853   :  { %v1348_v42 = vmul.f32 0.5, %v1347_v39 }
 0x854   :  { %v1359_v23 = vsub.f32 1.5, %v1358_v40 }
 0x855   :  { %v1349_v19 = vsub.f32 1.5, %v1348_v42 }
 0x856   :  { %v1360_v44 = vmul.f32 %v1670_v34, %v1359_v23 }
 0x857   :  { %v1350_v49 = vmul.f32 %v1672_v35, %v1349_v19 }
 0x858   :  { %v1364_v51 = vsel %vm1363_vm5, %v1670_v34, %v1360_v44 }
 0x859   :  { %v1369_v52 = vmul.f32 %v1364_v51, %v2072_v58  ;;  %v1370_v54 = vmul.f32 %v1364_v51, %v2077_v61  ;;  %v1371_v55 = vmul.f32 %v1364_v51, %v2082_v47  ;;  %v1372_v56 = vmul.f32 %v1364_v51, %v1279_v48 }
 0x85a   :  { %v1354_v57 = vsel %vm1353_vm7, %v1672_v35, %v1350_v49 }
 0x85b   :  { %1377 = vst.msk [vmem:[%s2140_s8 + $0x20] sm:$0xff] %vm1300_vm1, %v1369_v52  ;;  %v1365_v33 = vmul.f32 %v1354_v57, %v2057_v50  ;;  %v1366_v58 = vmul.f32 %v1354_v57, %v2062_v53  ;;  %v1367_v60 = vmul.f32 %v1354_v57, %v2067_v63  ;;  %v1368_v50 = vmul.f32 %v1354_v57, %v2086_v46 }
 0x85c   :  { %1378 = vst.msk [vmem:[%s2140_s8 + $0x28] sm:$0xff] %vm1300_vm1, %v1370_v54 }
 0x85d   :  { %1379 = vst.msk [vmem:[%s2140_s8 + $0x30] sm:$0xff] %vm1300_vm1, %v1371_v55 }
 0x85e   :  { %1380 = vst.msk [vmem:[%s2140_s8 + $0x38] sm:$0xff] %vm1300_vm1, %v1372_v56 }
 0x85f   :  { %1373 = vst.msk [vmem:[%s2140_s8] sm:$0xff] %vm1300_vm1, %v1365_v33 }
 0x860   :  { %1374 = vst.msk [vmem:[%s2140_s8 + $0x8] sm:$0xff] %vm1300_vm1, %v1366_v58 }
 0x861   :  { %1375 = vst.msk [vmem:[%s2140_s8 + $0x10] sm:$0xff] %vm1300_vm1, %v1367_v60 }
 0x862   :  { %1376 = vst.msk [vmem:[%s2140_s8 + $0x18] sm:$0xff] %vm1300_vm1, %v1368_v50 }

</bundles_post_ra>
